<compile_context>
chip_gen: v7x
topology: tpu7x:2x2x1
jax: 0.10.0
libtpu: 0.0.40
codegen_flags: <defaults>
</compile_context>

<pallas_src>
import functools
import math

import jax
import jax.numpy as jnp
from jax import lax
from jax.experimental import pallas as pl
from jax.experimental.pallas import tpu as pltpu


def _round_up(n, m):
    return ((n + m - 1) // m) * m


# ----------------------------------------------------------------------------
# Fused Pallas kernel: LSTM x2 (with pre-projected pos) + MHA(last query) + fc
# ----------------------------------------------------------------------------

def tft_fused_kernel(x_ref, posproj_ref, wl_ref, wattn_ref, wout_ref,
                     out_ref, gx_ref, h_ref, *, seq_len, batch, n_heads):
    # x_ref:       (S*Bp, Dp)  time-major, batch/feature padded input
    # posproj_ref: (S*Bp, 4H)  pos @ W_ih0^T + b0 (pre-scaled, batch-expanded)
    # wl_ref:      (Dp+3H+8, 4H) packed [wih0 | whh0 | wih1 | whh1 | b1 | pad]
    # wattn_ref:   (H+8, 3H)   packed [in_proj^T | in_proj_bias | pad]
    # wout_ref:    (H+8, O)    packed [out_proj^T @ fc^T | folded bias | pad]
    # out_ref:     (Bp, O)
    # gx_ref:      (S*Bp, 4H)  shared gate scratch (layer 0 then layer 1)
    # h_ref:       (S*Bp, H)   shared hidden scratch (h1 then encoder output)
    S, Bp, NH = seq_len, batch, n_heads
    SB, G = gx_ref.shape
    H = h_ref.shape[1]
    Dp = x_ref.shape[1]
    dh = H // NH

    # ---- static, 8-aligned views of the packed LSTM weights
    wih0 = wl_ref[0:Dp, :]
    whh0 = wl_ref[Dp:Dp + H, :]
    wih1 = wl_ref[Dp + H:Dp + 2 * H, :]
    whh1 = wl_ref[Dp + 2 * H:Dp + 3 * H, :]
    b1 = wl_ref[Dp + 3 * H:Dp + 3 * H + 1, :]

    # ---- layer-0 input projection for ALL timesteps: one 2-D MXU dot
    gx_ref[...] = (jnp.dot(x_ref[...], wih0, preferred_element_type=jnp.float32)
                   + posproj_ref[...])

    # g-gate (tanh) lane mask.  i/f/o columns were pre-scaled by 0.5 at prepare time so
    # sigmoid(z) = 0.5*(tanh(z/2)+1) -> a single tanh covers all four gates.
    lane = lax.broadcasted_iota(jnp.int32, (Bp, G), 1)
    g_mask = jnp.logical_and(lane >= 2 * H, lane < 3 * H)

    def run_lstm(whh):
        def step(t, carry):
            h, c = carry
            row = pl.multiple_of(t * Bp, Bp)
            gates = gx_ref[pl.ds(row, Bp), :] + jnp.dot(
                h, whh, preferred_element_type=jnp.float32)          # (Bp, 4H)
            th = jnp.tanh(gates)                                     # one gate EUP op
            act = jnp.where(g_mask, th, 0.5 * th + 0.5)              # tanh / sigmoid
            i_g = act[:, 0:H]
            f_g = act[:, H:2 * H]
            g_g = act[:, 2 * H:3 * H]
            o_g = act[:, 3 * H:4 * H]
            c_n = f_g * c + i_g * g_g
            h_n = o_g * jnp.tanh(c_n)
            h_ref[pl.ds(row, Bp), :] = h_n
            return h_n, c_n

        zero = jnp.zeros((Bp, H), jnp.float32)
        # S is small and static -> full unroll; switch to partial unroll if S grows.
        lax.fori_loop(0, S, step, (zero, zero), unroll=True)

    # ---- LSTM layer 0: consumes gx_ref, writes h1 into h_ref
    run_lstm(whh0)

    # ---- layer-1 input projection (one 2-D dot), reusing the same gate scratch
    gx_ref[...] = jnp.dot(h_ref[...], wih1, preferred_element_type=jnp.float32) + b1
    # ---- LSTM layer 1: h1 is dead now; overwrite h_ref with encoder outputs
    run_lstm(whh1)

    # ---- multi-head self-attention, LAST query only, all heads vectorized
    w_qkv = wattn_ref[0:H, :]                                        # (H, 3H)
    b_qkv = wattn_ref[H:H + 1, :]                                    # (1, 3H)
    h2 = h_ref[...]                                                  # (S*Bp, H)
    qkv = jnp.dot(h2, w_qkv, preferred_element_type=jnp.float32) + b_qkv   # (S*Bp, 3H)

    scale = 1.0 / math.sqrt(dh)
    q_last = qkv[(S - 1) * Bp:S * Bp, 0:H] * jnp.float32(scale)      # (Bp, H)
    k_all = qkv[:, H:2 * H].reshape(S, Bp, H)
    v_all = qkv[:, 2 * H:3 * H].reshape(S, Bp, H)

    # block-diagonal head-selection matrices, built once in registers (no extra DMAs)
    row_h = lax.broadcasted_iota(jnp.int32, (H, NH), 0)
    col_h = lax.broadcasted_iota(jnp.int32, (H, NH), 1)
    sel_hn = jnp.where((row_h >= col_h * dh) & (row_h < (col_h + 1) * dh),
                       1.0, 0.0).astype(jnp.float32)                 # (H, NH)
    row_n = lax.broadcasted_iota(jnp.int32, (NH, H), 0)
    col_n = lax.broadcasted_iota(jnp.int32, (NH, H), 1)
    sel_nh = jnp.where((col_n >= row_n * dh) & (col_n < (row_n + 1) * dh),
                       1.0, 0.0).astype(jnp.float32)                 # (NH, H)

    qk = (q_last[None, :, :] * k_all).reshape(SB, H)                 # (S*Bp, H)
    scores = jnp.dot(qk, sel_hn, preferred_element_type=jnp.float32)  # all head scores
    scores = scores.reshape(S, Bp, NH)
    m = jnp.max(scores, axis=0, keepdims=True)                       # softmax over keys
    e = jnp.exp(scores - m)
    denom = jnp.sum(e, axis=0, keepdims=True)                        # (1, Bp, NH)
    r = pl.reciprocal(denom, approx=True)
    r = r * (2.0 - denom * r)                                        # Newton -> f32 accuracy
    p = (e * r).reshape(SB, NH)
    p_full = jnp.dot(p, sel_nh, preferred_element_type=jnp.float32)  # expand to lanes
    ctx = jnp.sum(p_full.reshape(S, Bp, H) * v_all, axis=0)          # (Bp, H) all heads

    # out_proj and fc folded into a single affine map at prepare time (exact)
    w_of = wout_ref[0:H, :]                                          # (H, O)
    b_of = wout_ref[H:H + 1, :]                                      # (1, O)
    out_ref[...] = jnp.dot(ctx, w_of, preferred_element_type=jnp.float32) + b_of


# ----------------------------------------------------------------------------
# One-time parameter packing (all layout / algebraic folding out of the hot path)
# ----------------------------------------------------------------------------

def prepare_params(params):
    H = params['w_hh_l0'].shape[1]
    D = params['w_ih_l0'].shape[1]
    O = params['fc_w'].shape[0]
    G = 4 * H
    Dp = _round_up(max(D, 1), 8)

    # sigmoid(z) = 0.5*(tanh(z/2)+1): pre-scale i/f/o columns by 0.5 (PyTorch gate
    # order is i, f, g, o -> g columns [2H,3H) stay at 1.0).
    col = jnp.arange(G)
    colscale = jnp.where((col >= 2 * H) & (col < 3 * H), 1.0, 0.5).astype(jnp.float32)

    def prep_w(w):                                   # (4H, K) torch -> (K, 4H) scaled
        return jnp.transpose(w) * colscale[None, :]

    wih0 = prep_w(params['w_ih_l0'])                 # (D, G)
    whh0 = prep_w(params['w_hh_l0'])                 # (H, G)
    wih1 = prep_w(params['w_ih_l1'])                 # (H, G)
    whh1 = prep_w(params['w_hh_l1'])                 # (H, G)
    b0 = (params['b_ih_l0'] + params['b_hh_l0']) * colscale
    b1 = (params['b_ih_l1'] + params['b_hh_l1']) * colscale

    wih0_pad = jnp.zeros((Dp, G), jnp.float32).at[:D].set(wih0)
    w_lstm = jnp.concatenate(
        [wih0_pad, whh0, wih1, whh1, b1[None, :], jnp.zeros((7, G), jnp.float32)],
        axis=0)                                      # (Dp+3H+8, G)

    # positional contribution of layer 0 with b0 folded in: (S_max, G)
    posproj = params['pos_emb'][0] @ wih0 + b0[None, :]

    # packed attention in-projection (q|k|v columns) + bias row
    w_attn = jnp.concatenate(
        [jnp.transpose(params['in_proj_w']),         # (H, 3H)
         params['in_proj_b'][None, :],               # (1, 3H)
         jnp.zeros((7, 3 * H), jnp.float32)], axis=0)

    # fold out_proj and fc (both affine, no nonlinearity in between) into one map
    w_of = jnp.transpose(params['out_proj_w']) @ jnp.transpose(params['fc_w'])   # (H, O)
    b_of = (params['out_proj_b'][None, :] @ jnp.transpose(params['fc_w'])
            + params['fc_b'][None, :])                                           # (1, O)
    w_out = jnp.concatenate([w_of, b_of, jnp.zeros((7, O), jnp.float32)], axis=0)

    return {'posproj': posproj, 'w_lstm': w_lstm, 'w_attn': w_attn, 'w_out': w_out}


def _full_spec(shape):
    return pl.BlockSpec(shape, lambda: (0,) * len(shape))


def tft_forward(prepped, x, *, n_heads):
    B, S, D = x.shape
    G = prepped['w_lstm'].shape[1]
    H = G // 4
    O = prepped['w_out'].shape[1]
    Dp = prepped['w_lstm'].shape[0] - 3 * H - 8
    Bp = _round_up(max(B, 8), 8)                     # sublane-aligned batch
    if S > prepped['posproj'].shape[0]:
        raise ValueError("seq_len exceeds positional embedding length")

    # Tiny wrapper-side relayout: time-major, batch/feature zero-padded, flattened to
    # 2-D so every in-kernel matmul is a single (S*Bp, K) @ (K, N) MXU dot.
    x_tm = jnp.swapaxes(x, 0, 1).astype(jnp.float32)                 # (S, B, D)
    x_p = jnp.zeros((S, Bp, Dp), jnp.float32).at[:, :B, :D].set(x_tm)
    x2d = x_p.reshape(S * Bp, Dp)
    posproj = jnp.broadcast_to(prepped['posproj'][:S, None, :],
                               (S, Bp, G)).reshape(S * Bp, G)

    operands = (x2d, posproj, prepped['w_lstm'], prepped['w_attn'], prepped['w_out'])
    kernel = functools.partial(tft_fused_kernel, seq_len=S, batch=Bp, n_heads=n_heads)
    out_p = pl.pallas_call(
        kernel,
        out_shape=jax.ShapeDtypeStruct((Bp, O), jnp.float32),
        in_specs=[_full_spec(op.shape) for op in operands],
        out_specs=_full_spec((Bp, O)),
        scratch_shapes=[
            pltpu.VMEM((S * Bp, G), jnp.float32),    # gate buffer, reused by both layers
            pltpu.VMEM((S * Bp, H), jnp.float32),    # hidden buffer: h1, then encoder out
        ],
        # Scale-up note: for production B, add a grid over batch blocks with
        # dimension_semantics=("parallel",) (second v7x TensorCore) and set
        # vmem_limit_bytes explicitly; at these shapes a gridless call is optimal.
    )(*operands)
    return out_p[:B]


# ----------------------------------------------------------------------------
# Pure-JAX reference (PyTorch eval semantics) for verification
# ----------------------------------------------------------------------------

def _lstm_layer_ref(x, w_ih, w_hh, b_ih, b_hh):
    B, S, _ = x.shape
    H = w_hh.shape[1]

    def step(carry, x_t):
        h, c = carry
        gates = x_t @ w_ih.T + b_ih + h @ w_hh.T + b_hh
        i = jax.nn.sigmoid(gates[:, :H]); f = jax.nn.sigmoid(gates[:, H:2 * H])
        g = jnp.tanh(gates[:, 2 * H:3 * H]); o = jax.nn.sigmoid(gates[:, 3 * H:])
        c = f * c + i * g
        h = o * jnp.tanh(c)
        return (h, c), h

    (_, _), hs = lax.scan(step, (jnp.zeros((B, H)), jnp.zeros((B, H))),
                          jnp.swapaxes(x, 0, 1))
    return jnp.swapaxes(hs, 0, 1)


def tft_forward_ref(params, x, n_heads):
    B, S, _ = x.shape
    x = x + params['pos_emb'][:, :S, :]
    x = _lstm_layer_ref(x, params['w_ih_l0'], params['w_hh_l0'],
                        params['b_ih_l0'], params['b_hh_l0'])
    x = _lstm_layer_ref(x, params['w_ih_l1'], params['w_hh_l1'],
                        params['b_ih_l1'], params['b_hh_l1'])
    H = x.shape[-1]
    dh = H // n_heads
    qkv = x @ params['in_proj_w'].T + params['in_proj_b']
    q, k, v = qkv[..., :H], qkv[..., H:2 * H], qkv[..., 2 * H:]
    q = q.reshape(B, S, n_heads, dh); k = k.reshape(B, S, n_heads, dh)
    v = v.reshape(B, S, n_heads, dh)
    s = jnp.einsum('bqnd,bknd->bnqk', q, k) / math.sqrt(dh)
    p = jax.nn.softmax(s, axis=-1)
    o = jnp.einsum('bnqk,bknd->bqnd', p, v).reshape(B, S, H)
    o = o @ params['out_proj_w'].T + params['out_proj_b']
    last = o[:, -1, :]
    return last @ params['fc_w'].T + params['fc_b']


# ----------------------------------------------------------------------------
# Deterministic parameter construction + main
# ----------------------------------------------------------------------------

def make_params(key, input_dim, hidden_dim, output_dim, seq_len_max):
    ks = jax.random.split(key, 16)
    n = lambda k, shape, scale: scale * jax.random.normal(k, shape, jnp.float32)
    H, D, O = hidden_dim, input_dim, output_dim
    s_in = 1.0 / math.sqrt(max(D, 1))
    s_h = 1.0 / math.sqrt(H)
    return {
        'pos_emb':    n(ks[0], (1, seq_len_max, D), 1.0),
        'w_ih_l0':    n(ks[1], (4 * H, D), s_in),
        'w_hh_l0':    n(ks[2], (4 * H, H), s_h),
        'b_ih_l0':    n(ks[3], (4 * H,), s_h),
        'b_hh_l0':    n(ks[4], (4 * H,), s_h),
        'w_ih_l1':    n(ks[5], (4 * H, H), s_h),
        'w_hh_l1':    n(ks[6], (4 * H, H), s_h),
        'b_ih_l1':    n(ks[7], (4 * H,), s_h),
        'b_hh_l1':    n(ks[8], (4 * H,), s_h),
        'in_proj_w':  n(ks[9], (3 * H, H), s_h),
        'in_proj_b':  n(ks[10], (3 * H,), s_h),
        'out_proj_w': n(ks[11], (H, H), s_h),
        'out_proj_b': n(ks[12], (H,), s_h),
        'fc_w':       n(ks[13], (O, H), s_h),
        'fc_b':       n(ks[14], (O,), s_h),
    }


if __name__ == "__main__":
    # Small shapes consistent with the module's forward.
    B, S, D, H, NH, O = 2, 8, 4, 32, 4, 1
    SEQ_LEN_MAX = 12

    root = jax.random.PRNGKey(0)
    k_params, k_x = jax.random.split(root)
    params = make_params(k_params, D, H, O, SEQ_LEN_MAX)
    x = jax.random.normal(k_x, (B, S, D), jnp.float32)

    prepped = prepare_params(params)                 # one-time packing / folding
    fwd = jax.jit(functools.partial(tft_forward, n_heads=NH))

    y = jax.block_until_ready(fwd(prepped, x))
    y_ref = tft_forward_ref(params, x, NH)

    assert y.shape == (B, O), y.shape
    assert bool(jnp.allclose(y, y_ref, atol=1e-4, rtol=1e-4)), (y, y_ref)

    print("KERNEL_OK")
</pallas_src>

<mosaic_0001>
module attributes {stable_mosaic.version = 11 : i64} {
  func.func @tft_fused_kernel(%arg0: memref<64x8xf32, #tpu.memory_space<vmem>>, %arg1: memref<64x128xf32, #tpu.memory_space<vmem>>, %arg2: memref<112x128xf32, #tpu.memory_space<vmem>>, %arg3: memref<40x96xf32, #tpu.memory_space<vmem>>, %arg4: memref<40x1xf32, #tpu.memory_space<vmem>>, %arg5: memref<8x1xf32, #tpu.memory_space<vmem>>, %arg6: memref<64x128xf32, #tpu.memory_space<vmem>>, %arg7: memref<64x32xf32, #tpu.memory_space<vmem>>) attributes {dimension_semantics = [], scalar_prefetch = 0 : i64, scratch_operands = 2 : i64, tpu.core_type = #tpu.core_type<tc>} {
    %c0 = arith.constant 0 : index
    %c0_0 = arith.constant 0 : index
    %0 = vector.load %arg2[%c0, %c0_0] : memref<112x128xf32, #tpu.memory_space<vmem>>, vector<8x128xf32>
    %c8 = arith.constant 8 : index
    %c0_1 = arith.constant 0 : index
    %1 = vector.load %arg2[%c8, %c0_1] : memref<112x128xf32, #tpu.memory_space<vmem>>, vector<32x128xf32>
    %c40 = arith.constant 40 : index
    %c0_2 = arith.constant 0 : index
    %2 = vector.load %arg2[%c40, %c0_2] : memref<112x128xf32, #tpu.memory_space<vmem>>, vector<32x128xf32>
    %c72 = arith.constant 72 : index
    %c0_3 = arith.constant 0 : index
    %3 = vector.load %arg2[%c72, %c0_3] : memref<112x128xf32, #tpu.memory_space<vmem>>, vector<32x128xf32>
    %c104 = arith.constant 104 : index
    %c0_4 = arith.constant 0 : index
    %4 = vector.load %arg2[%c104, %c0_4] : memref<112x128xf32, #tpu.memory_space<vmem>>, vector<1x128xf32>
    %c0_5 = arith.constant 0 : index
    %c0_6 = arith.constant 0 : index
    %5 = vector.load %arg0[%c0_5, %c0_6] : memref<64x8xf32, #tpu.memory_space<vmem>>, vector<64x8xf32>
    %cst = arith.constant dense<0.000000e+00> : vector<64x128xf32>
    %6 = tpu.matmul %5, %0, %cst {dimension_numbers = #tpu.dot_dimension_numbers<[1], [0], [0], [1], [0, 0, 1, 1], [], []>} : vector<64x8xf32>, vector<8x128xf32>, vector<64x128xf32> -> vector<64x128xf32>
    %c0_7 = arith.constant 0 : index
    %c0_8 = arith.constant 0 : index
    %7 = vector.load %arg1[%c0_7, %c0_8] : memref<64x128xf32, #tpu.memory_space<vmem>>, vector<64x128xf32>
    %8 = arith.addf %6, %7 : vector<64x128xf32>
    %c0_9 = arith.constant 0 : index
    %c0_10 = arith.constant 0 : index
    %9 = vector.load %arg6[%c0_9, %c0_10] : memref<64x128xf32, #tpu.memory_space<vmem>>, vector<64x128xf32>
    tpu.vector_store %arg6[%c0_9, %c0_10], %8 {strides = array<i32>} : memref<64x128xf32, #tpu.memory_space<vmem>>, vector<64x128xf32>,
    %10 = tpu.iota {dimensions = array<i32: 1>} : vector<8x128xi32>
    %c64_i32 = arith.constant 64 : i32
    %11 = vector.broadcast %c64_i32 : i32 to vector<8x128xi32>
    %12 = arith.cmpi sge, %10, %11 : vector<8x128xi32>
    %c96_i32 = arith.constant 96 : i32
    %13 = vector.broadcast %c96_i32 : i32 to vector<8x128xi32>
    %14 = arith.cmpi slt, %10, %13 : vector<8x128xi32>
    %15 = arith.andi %12, %14 : vector<8x128xi1>
    %cst_11 = arith.constant 0.000000e+00 : f32
    %16 = vector.broadcast %cst_11 : f32 to vector<8x32xf32>
    %c0_i32 = arith.constant 0 : i32
    %c8_i32 = arith.constant 8 : i32
    %17 = arith.muli %c0_i32, %c8_i32 : i32
    %18 = tpu.assume_multiple %17, 8 : i32
    %19 = arith.index_cast %18 : i32 to index
    %c0_12 = arith.constant 0 : index
    %20 = vector.load %arg6[%19, %c0_12] : memref<64x128xf32, #tpu.memory_space<vmem>>, vector<8x128xf32>
    %cst_13 = arith.constant dense<0.000000e+00> : vector<8x128xf32>
    %21 = tpu.matmul %16, %1, %cst_13 {dimension_numbers = #tpu.dot_dimension_numbers<[1], [0], [0], [1], [0, 0, 1, 1], [], []>} : vector<8x32xf32>, vector<32x128xf32>, vector<8x128xf32> -> vector<8x128xf32>
    %22 = arith.addf %20, %21 : vector<8x128xf32>
    %23 = math.tanh %22 : vector<8x128xf32>
    %cst_14 = arith.constant 5.000000e-01 : f32
    %24 = vector.broadcast %cst_14 : f32 to vector<8x128xf32>
    %25 = arith.mulf %24, %23 : vector<8x128xf32>
    %cst_15 = arith.constant 5.000000e-01 : f32
    %26 = vector.broadcast %cst_15 : f32 to vector<8x128xf32>
    %27 = arith.addf %25, %26 : vector<8x128xf32>
    %28 = arith.select %15, %23, %27 : vector<8x128xi1>, vector<8x128xf32>
    %29 = vector.extract_strided_slice %28 {offsets = [0, 0], sizes = [8, 32], strides = [1, 1]} : vector<8x128xf32> to vector<8x32xf32>
    %30 = vector.extract_strided_slice %28 {offsets = [0, 32], sizes = [8, 32], strides = [1, 1]} : vector<8x128xf32> to vector<8x32xf32>
    %31 = vector.extract_strided_slice %28 {offsets = [0, 64], sizes = [8, 32], strides = [1, 1]} : vector<8x128xf32> to vector<8x32xf32>
    %32 = vector.extract_strided_slice %28 {offsets = [0, 96], sizes = [8, 32], strides = [1, 1]} : vector<8x128xf32> to vector<8x32xf32>
    %33 = arith.mulf %30, %16 : vector<8x32xf32>
    %34 = arith.mulf %29, %31 : vector<8x32xf32>
    %35 = arith.addf %33, %34 : vector<8x32xf32>
    %36 = math.tanh %35 : vector<8x32xf32>
    %37 = arith.mulf %32, %36 : vector<8x32xf32>
    %38 = arith.index_cast %18 : i32 to index
    %c0_16 = arith.constant 0 : index
    %39 = vector.load %arg7[%38, %c0_16] : memref<64x32xf32, #tpu.memory_space<vmem>>, vector<8x32xf32>
    tpu.vector_store %arg7[%38, %c0_16], %37 {strides = array<i32>} : memref<64x32xf32, #tpu.memory_space<vmem>>, vector<8x32xf32>,
    %c1_i32 = arith.constant 1 : i32
    %c8_i32_17 = arith.constant 8 : i32
    %40 = arith.muli %c1_i32, %c8_i32_17 : i32
    %41 = tpu.assume_multiple %40, 8 : i32
    %42 = arith.index_cast %41 : i32 to index
    %c0_18 = arith.constant 0 : index
    %43 = vector.load %arg6[%42, %c0_18] : memref<64x128xf32, #tpu.memory_space<vmem>>, vector<8x128xf32>
    %cst_19 = arith.constant dense<0.000000e+00> : vector<8x128xf32>
    %44 = tpu.matmul %37, %1, %cst_19 {dimension_numbers = #tpu.dot_dimension_numbers<[1], [0], [0], [1], [0, 0, 1, 1], [], []>} : vector<8x32xf32>, vector<32x128xf32>, vector<8x128xf32> -> vector<8x128xf32>
    %45 = arith.addf %43, %44 : vector<8x128xf32>
    %46 = math.tanh %45 : vector<8x128xf32>
    %cst_20 = arith.constant 5.000000e-01 : f32
    %47 = vector.broadcast %cst_20 : f32 to vector<8x128xf32>
    %48 = arith.mulf %47, %46 : vector<8x128xf32>
    %cst_21 = arith.constant 5.000000e-01 : f32
    %49 = vector.broadcast %cst_21 : f32 to vector<8x128xf32>
    %50 = arith.addf %48, %49 : vector<8x128xf32>
    %51 = arith.select %15, %46, %50 : vector<8x128xi1>, vector<8x128xf32>
    %52 = vector.extract_strided_slice %51 {offsets = [0, 0], sizes = [8, 32], strides = [1, 1]} : vector<8x128xf32> to vector<8x32xf32>
    %53 = vector.extract_strided_slice %51 {offsets = [0, 32], sizes = [8, 32], strides = [1, 1]} : vector<8x128xf32> to vector<8x32xf32>
    %54 = vector.extract_strided_slice %51 {offsets = [0, 64], sizes = [8, 32], strides = [1, 1]} : vector<8x128xf32> to vector<8x32xf32>
    %55 = vector.extract_strided_slice %51 {offsets = [0, 96], sizes = [8, 32], strides = [1, 1]} : vector<8x128xf32> to vector<8x32xf32>
    %56 = arith.mulf %53, %35 : vector<8x32xf32>
    %57 = arith.mulf %52, %54 : vector<8x32xf32>
    %58 = arith.addf %56, %57 : vector<8x32xf32>
    %59 = math.tanh %58 : vector<8x32xf32>
    %60 = arith.mulf %55, %59 : vector<8x32xf32>
    %61 = arith.index_cast %41 : i32 to index
    %c0_22 = arith.constant 0 : index
    %62 = vector.load %arg7[%61, %c0_22] : memref<64x32xf32, #tpu.memory_space<vmem>>, vector<8x32xf32>
    tpu.vector_store %arg7[%61, %c0_22], %60 {strides = array<i32>} : memref<64x32xf32, #tpu.memory_space<vmem>>, vector<8x32xf32>,
    %c2_i32 = arith.constant 2 : i32
    %c8_i32_23 = arith.constant 8 : i32
    %63 = arith.muli %c2_i32, %c8_i32_23 : i32
    %64 = tpu.assume_multiple %63, 8 : i32
    %65 = arith.index_cast %64 : i32 to index
    %c0_24 = arith.constant 0 : index
    %66 = vector.load %arg6[%65, %c0_24] : memref<64x128xf32, #tpu.memory_space<vmem>>, vector<8x128xf32>
    %cst_25 = arith.constant dense<0.000000e+00> : vector<8x128xf32>
    %67 = tpu.matmul %60, %1, %cst_25 {dimension_numbers = #tpu.dot_dimension_numbers<[1], [0], [0], [1], [0, 0, 1, 1], [], []>} : vector<8x32xf32>, vector<32x128xf32>, vector<8x128xf32> -> vector<8x128xf32>
    %68 = arith.addf %66, %67 : vector<8x128xf32>
    %69 = math.tanh %68 : vector<8x128xf32>
    %cst_26 = arith.constant 5.000000e-01 : f32
    %70 = vector.broadcast %cst_26 : f32 to vector<8x128xf32>
    %71 = arith.mulf %70, %69 : vector<8x128xf32>
    %cst_27 = arith.constant 5.000000e-01 : f32
    %72 = vector.broadcast %cst_27 : f32 to vector<8x128xf32>
    %73 = arith.addf %71, %72 : vector<8x128xf32>
    %74 = arith.select %15, %69, %73 : vector<8x128xi1>, vector<8x128xf32>
    %75 = vector.extract_strided_slice %74 {offsets = [0, 0], sizes = [8, 32], strides = [1, 1]} : vector<8x128xf32> to vector<8x32xf32>
    %76 = vector.extract_strided_slice %74 {offsets = [0, 32], sizes = [8, 32], strides = [1, 1]} : vector<8x128xf32> to vector<8x32xf32>
    %77 = vector.extract_strided_slice %74 {offsets = [0, 64], sizes = [8, 32], strides = [1, 1]} : vector<8x128xf32> to vector<8x32xf32>
    %78 = vector.extract_strided_slice %74 {offsets = [0, 96], sizes = [8, 32], strides = [1, 1]} : vector<8x128xf32> to vector<8x32xf32>
    %79 = arith.mulf %76, %58 : vector<8x32xf32>
    %80 = arith.mulf %75, %77 : vector<8x32xf32>
    %81 = arith.addf %79, %80 : vector<8x32xf32>
    %82 = math.tanh %81 : vector<8x32xf32>
    %83 = arith.mulf %78, %82 : vector<8x32xf32>
    %84 = arith.index_cast %64 : i32 to index
    %c0_28 = arith.constant 0 : index
    %85 = vector.load %arg7[%84, %c0_28] : memref<64x32xf32, #tpu.memory_space<vmem>>, vector<8x32xf32>
    tpu.vector_store %arg7[%84, %c0_28], %83 {strides = array<i32>} : memref<64x32xf32, #tpu.memory_space<vmem>>, vector<8x32xf32>,
    %c3_i32 = arith.constant 3 : i32
    %c8_i32_29 = arith.constant 8 : i32
    %86 = arith.muli %c3_i32, %c8_i32_29 : i32
    %87 = tpu.assume_multiple %86, 8 : i32
    %88 = arith.index_cast %87 : i32 to index
    %c0_30 = arith.constant 0 : index
    %89 = vector.load %arg6[%88, %c0_30] : memref<64x128xf32, #tpu.memory_space<vmem>>, vector<8x128xf32>
    %cst_31 = arith.constant dense<0.000000e+00> : vector<8x128xf32>
    %90 = tpu.matmul %83, %1, %cst_31 {dimension_numbers = #tpu.dot_dimension_numbers<[1], [0], [0], [1], [0, 0, 1, 1], [], []>} : vector<8x32xf32>, vector<32x128xf32>, vector<8x128xf32> -> vector<8x128xf32>
    %91 = arith.addf %89, %90 : vector<8x128xf32>
    %92 = math.tanh %91 : vector<8x128xf32>
    %cst_32 = arith.constant 5.000000e-01 : f32
    %93 = vector.broadcast %cst_32 : f32 to vector<8x128xf32>
    %94 = arith.mulf %93, %92 : vector<8x128xf32>
    %cst_33 = arith.constant 5.000000e-01 : f32
    %95 = vector.broadcast %cst_33 : f32 to vector<8x128xf32>
    %96 = arith.addf %94, %95 : vector<8x128xf32>
    %97 = arith.select %15, %92, %96 : vector<8x128xi1>, vector<8x128xf32>
    %98 = vector.extract_strided_slice %97 {offsets = [0, 0], sizes = [8, 32], strides = [1, 1]} : vector<8x128xf32> to vector<8x32xf32>
    %99 = vector.extract_strided_slice %97 {offsets = [0, 32], sizes = [8, 32], strides = [1, 1]} : vector<8x128xf32> to vector<8x32xf32>
    %100 = vector.extract_strided_slice %97 {offsets = [0, 64], sizes = [8, 32], strides = [1, 1]} : vector<8x128xf32> to vector<8x32xf32>
    %101 = vector.extract_strided_slice %97 {offsets = [0, 96], sizes = [8, 32], strides = [1, 1]} : vector<8x128xf32> to vector<8x32xf32>
    %102 = arith.mulf %99, %81 : vector<8x32xf32>
    %103 = arith.mulf %98, %100 : vector<8x32xf32>
    %104 = arith.addf %102, %103 : vector<8x32xf32>
    %105 = math.tanh %104 : vector<8x32xf32>
    %106 = arith.mulf %101, %105 : vector<8x32xf32>
    %107 = arith.index_cast %87 : i32 to index
    %c0_34 = arith.constant 0 : index
    %108 = vector.load %arg7[%107, %c0_34] : memref<64x32xf32, #tpu.memory_space<vmem>>, vector<8x32xf32>
    tpu.vector_store %arg7[%107, %c0_34], %106 {strides = array<i32>} : memref<64x32xf32, #tpu.memory_space<vmem>>, vector<8x32xf32>,
    %c4_i32 = arith.constant 4 : i32
    %c8_i32_35 = arith.constant 8 : i32
    %109 = arith.muli %c4_i32, %c8_i32_35 : i32
    %110 = tpu.assume_multiple %109, 8 : i32
    %111 = arith.index_cast %110 : i32 to index
    %c0_36 = arith.constant 0 : index
    %112 = vector.load %arg6[%111, %c0_36] : memref<64x128xf32, #tpu.memory_space<vmem>>, vector<8x128xf32>
    %cst_37 = arith.constant dense<0.000000e+00> : vector<8x128xf32>
    %113 = tpu.matmul %106, %1, %cst_37 {dimension_numbers = #tpu.dot_dimension_numbers<[1], [0], [0], [1], [0, 0, 1, 1], [], []>} : vector<8x32xf32>, vector<32x128xf32>, vector<8x128xf32> -> vector<8x128xf32>
    %114 = arith.addf %112, %113 : vector<8x128xf32>
    %115 = math.tanh %114 : vector<8x128xf32>
    %cst_38 = arith.constant 5.000000e-01 : f32
    %116 = vector.broadcast %cst_38 : f32 to vector<8x128xf32>
    %117 = arith.mulf %116, %115 : vector<8x128xf32>
    %cst_39 = arith.constant 5.000000e-01 : f32
    %118 = vector.broadcast %cst_39 : f32 to vector<8x128xf32>
    %119 = arith.addf %117, %118 : vector<8x128xf32>
    %120 = arith.select %15, %115, %119 : vector<8x128xi1>, vector<8x128xf32>
    %121 = vector.extract_strided_slice %120 {offsets = [0, 0], sizes = [8, 32], strides = [1, 1]} : vector<8x128xf32> to vector<8x32xf32>
    %122 = vector.extract_strided_slice %120 {offsets = [0, 32], sizes = [8, 32], strides = [1, 1]} : vector<8x128xf32> to vector<8x32xf32>
    %123 = vector.extract_strided_slice %120 {offsets = [0, 64], sizes = [8, 32], strides = [1, 1]} : vector<8x128xf32> to vector<8x32xf32>
    %124 = vector.extract_strided_slice %120 {offsets = [0, 96], sizes = [8, 32], strides = [1, 1]} : vector<8x128xf32> to vector<8x32xf32>
    %125 = arith.mulf %122, %104 : vector<8x32xf32>
    %126 = arith.mulf %121, %123 : vector<8x32xf32>
    %127 = arith.addf %125, %126 : vector<8x32xf32>
    %128 = math.tanh %127 : vector<8x32xf32>
    %129 = arith.mulf %124, %128 : vector<8x32xf32>
    %130 = arith.index_cast %110 : i32 to index
    %c0_40 = arith.constant 0 : index
    %131 = vector.load %arg7[%130, %c0_40] : memref<64x32xf32, #tpu.memory_space<vmem>>, vector<8x32xf32>
    tpu.vector_store %arg7[%130, %c0_40], %129 {strides = array<i32>} : memref<64x32xf32, #tpu.memory_space<vmem>>, vector<8x32xf32>,
    %c5_i32 = arith.constant 5 : i32
    %c8_i32_41 = arith.constant 8 : i32
    %132 = arith.muli %c5_i32, %c8_i32_41 : i32
    %133 = tpu.assume_multiple %132, 8 : i32
    %134 = arith.index_cast %133 : i32 to index
    %c0_42 = arith.constant 0 : index
    %135 = vector.load %arg6[%134, %c0_42] : memref<64x128xf32, #tpu.memory_space<vmem>>, vector<8x128xf32>
    %cst_43 = arith.constant dense<0.000000e+00> : vector<8x128xf32>
    %136 = tpu.matmul %129, %1, %cst_43 {dimension_numbers = #tpu.dot_dimension_numbers<[1], [0], [0], [1], [0, 0, 1, 1], [], []>} : vector<8x32xf32>, vector<32x128xf32>, vector<8x128xf32> -> vector<8x128xf32>
    %137 = arith.addf %135, %136 : vector<8x128xf32>
    %138 = math.tanh %137 : vector<8x128xf32>
    %cst_44 = arith.constant 5.000000e-01 : f32
    %139 = vector.broadcast %cst_44 : f32 to vector<8x128xf32>
    %140 = arith.mulf %139, %138 : vector<8x128xf32>
    %cst_45 = arith.constant 5.000000e-01 : f32
    %141 = vector.broadcast %cst_45 : f32 to vector<8x128xf32>
    %142 = arith.addf %140, %141 : vector<8x128xf32>
    %143 = arith.select %15, %138, %142 : vector<8x128xi1>, vector<8x128xf32>
    %144 = vector.extract_strided_slice %143 {offsets = [0, 0], sizes = [8, 32], strides = [1, 1]} : vector<8x128xf32> to vector<8x32xf32>
    %145 = vector.extract_strided_slice %143 {offsets = [0, 32], sizes = [8, 32], strides = [1, 1]} : vector<8x128xf32> to vector<8x32xf32>
    %146 = vector.extract_strided_slice %143 {offsets = [0, 64], sizes = [8, 32], strides = [1, 1]} : vector<8x128xf32> to vector<8x32xf32>
    %147 = vector.extract_strided_slice %143 {offsets = [0, 96], sizes = [8, 32], strides = [1, 1]} : vector<8x128xf32> to vector<8x32xf32>
    %148 = arith.mulf %145, %127 : vector<8x32xf32>
    %149 = arith.mulf %144, %146 : vector<8x32xf32>
    %150 = arith.addf %148, %149 : vector<8x32xf32>
    %151 = math.tanh %150 : vector<8x32xf32>
    %152 = arith.mulf %147, %151 : vector<8x32xf32>
    %153 = arith.index_cast %133 : i32 to index
    %c0_46 = arith.constant 0 : index
    %154 = vector.load %arg7[%153, %c0_46] : memref<64x32xf32, #tpu.memory_space<vmem>>, vector<8x32xf32>
    tpu.vector_store %arg7[%153, %c0_46], %152 {strides = array<i32>} : memref<64x32xf32, #tpu.memory_space<vmem>>, vector<8x32xf32>,
    %c6_i32 = arith.constant 6 : i32
    %c8_i32_47 = arith.constant 8 : i32
    %155 = arith.muli %c6_i32, %c8_i32_47 : i32
    %156 = tpu.assume_multiple %155, 8 : i32
    %157 = arith.index_cast %156 : i32 to index
    %c0_48 = arith.constant 0 : index
    %158 = vector.load %arg6[%157, %c0_48] : memref<64x128xf32, #tpu.memory_space<vmem>>, vector<8x128xf32>
    %cst_49 = arith.constant dense<0.000000e+00> : vector<8x128xf32>
    %159 = tpu.matmul %152, %1, %cst_49 {dimension_numbers = #tpu.dot_dimension_numbers<[1], [0], [0], [1], [0, 0, 1, 1], [], []>} : vector<8x32xf32>, vector<32x128xf32>, vector<8x128xf32> -> vector<8x128xf32>
    %160 = arith.addf %158, %159 : vector<8x128xf32>
    %161 = math.tanh %160 : vector<8x128xf32>
    %cst_50 = arith.constant 5.000000e-01 : f32
    %162 = vector.broadcast %cst_50 : f32 to vector<8x128xf32>
    %163 = arith.mulf %162, %161 : vector<8x128xf32>
    %cst_51 = arith.constant 5.000000e-01 : f32
    %164 = vector.broadcast %cst_51 : f32 to vector<8x128xf32>
    %165 = arith.addf %163, %164 : vector<8x128xf32>
    %166 = arith.select %15, %161, %165 : vector<8x128xi1>, vector<8x128xf32>
    %167 = vector.extract_strided_slice %166 {offsets = [0, 0], sizes = [8, 32], strides = [1, 1]} : vector<8x128xf32> to vector<8x32xf32>
    %168 = vector.extract_strided_slice %166 {offsets = [0, 32], sizes = [8, 32], strides = [1, 1]} : vector<8x128xf32> to vector<8x32xf32>
    %169 = vector.extract_strided_slice %166 {offsets = [0, 64], sizes = [8, 32], strides = [1, 1]} : vector<8x128xf32> to vector<8x32xf32>
    %170 = vector.extract_strided_slice %166 {offsets = [0, 96], sizes = [8, 32], strides = [1, 1]} : vector<8x128xf32> to vector<8x32xf32>
    %171 = arith.mulf %168, %150 : vector<8x32xf32>
    %172 = arith.mulf %167, %169 : vector<8x32xf32>
    %173 = arith.addf %171, %172 : vector<8x32xf32>
    %174 = math.tanh %173 : vector<8x32xf32>
    %175 = arith.mulf %170, %174 : vector<8x32xf32>
    %176 = arith.index_cast %156 : i32 to index
    %c0_52 = arith.constant 0 : index
    %177 = vector.load %arg7[%176, %c0_52] : memref<64x32xf32, #tpu.memory_space<vmem>>, vector<8x32xf32>
    tpu.vector_store %arg7[%176, %c0_52], %175 {strides = array<i32>} : memref<64x32xf32, #tpu.memory_space<vmem>>, vector<8x32xf32>,
    %c7_i32 = arith.constant 7 : i32
    %c8_i32_53 = arith.constant 8 : i32
    %178 = arith.muli %c7_i32, %c8_i32_53 : i32
    %179 = tpu.assume_multiple %178, 8 : i32
    %180 = arith.index_cast %179 : i32 to index
    %c0_54 = arith.constant 0 : index
    %181 = vector.load %arg6[%180, %c0_54] : memref<64x128xf32, #tpu.memory_space<vmem>>, vector<8x128xf32>
    %cst_55 = arith.constant dense<0.000000e+00> : vector<8x128xf32>
    %182 = tpu.matmul %175, %1, %cst_55 {dimension_numbers = #tpu.dot_dimension_numbers<[1], [0], [0], [1], [0, 0, 1, 1], [], []>} : vector<8x32xf32>, vector<32x128xf32>, vector<8x128xf32> -> vector<8x128xf32>
    %183 = arith.addf %181, %182 : vector<8x128xf32>
    %184 = math.tanh %183 : vector<8x128xf32>
    %cst_56 = arith.constant 5.000000e-01 : f32
    %185 = vector.broadcast %cst_56 : f32 to vector<8x128xf32>
    %186 = arith.mulf %185, %184 : vector<8x128xf32>
    %cst_57 = arith.constant 5.000000e-01 : f32
    %187 = vector.broadcast %cst_57 : f32 to vector<8x128xf32>
    %188 = arith.addf %186, %187 : vector<8x128xf32>
    %189 = arith.select %15, %184, %188 : vector<8x128xi1>, vector<8x128xf32>
    %190 = vector.extract_strided_slice %189 {offsets = [0, 0], sizes = [8, 32], strides = [1, 1]} : vector<8x128xf32> to vector<8x32xf32>
    %191 = vector.extract_strided_slice %189 {offsets = [0, 32], sizes = [8, 32], strides = [1, 1]} : vector<8x128xf32> to vector<8x32xf32>
    %192 = vector.extract_strided_slice %189 {offsets = [0, 64], sizes = [8, 32], strides = [1, 1]} : vector<8x128xf32> to vector<8x32xf32>
    %193 = vector.extract_strided_slice %189 {offsets = [0, 96], sizes = [8, 32], strides = [1, 1]} : vector<8x128xf32> to vector<8x32xf32>
    %194 = arith.mulf %191, %173 : vector<8x32xf32>
    %195 = arith.mulf %190, %192 : vector<8x32xf32>
    %196 = arith.addf %194, %195 : vector<8x32xf32>
    %197 = math.tanh %196 : vector<8x32xf32>
    %198 = arith.mulf %193, %197 : vector<8x32xf32>
    %199 = arith.index_cast %179 : i32 to index
    %c0_58 = arith.constant 0 : index
    %200 = vector.load %arg7[%199, %c0_58] : memref<64x32xf32, #tpu.memory_space<vmem>>, vector<8x32xf32>
    tpu.vector_store %arg7[%199, %c0_58], %198 {strides = array<i32>} : memref<64x32xf32, #tpu.memory_space<vmem>>, vector<8x32xf32>,
    %c8_i32_59 = arith.constant 8 : i32
    %c0_60 = arith.constant 0 : index
    %c0_61 = arith.constant 0 : index
    %201 = vector.load %arg7[%c0_60, %c0_61] : memref<64x32xf32, #tpu.memory_space<vmem>>, vector<64x32xf32>
    %cst_62 = arith.constant dense<0.000000e+00> : vector<64x128xf32>
    %202 = tpu.matmul %201, %2, %cst_62 {dimension_numbers = #tpu.dot_dimension_numbers<[1], [0], [0], [1], [0, 0, 1, 1], [], []>} : vector<64x32xf32>, vector<32x128xf32>, vector<64x128xf32> -> vector<64x128xf32>
    %203 = vector.broadcast %4 : vector<1x128xf32> to vector<64x128xf32>
    %204 = arith.addf %202, %203 : vector<64x128xf32>
    %c0_63 = arith.constant 0 : index
    %c0_64 = arith.constant 0 : index
    %205 = vector.load %arg6[%c0_63, %c0_64] : memref<64x128xf32, #tpu.memory_space<vmem>>, vector<64x128xf32>
    tpu.vector_store %arg6[%c0_63, %c0_64], %204 {strides = array<i32>} : memref<64x128xf32, #tpu.memory_space<vmem>>, vector<64x128xf32>,
    %cst_65 = arith.constant 0.000000e+00 : f32
    %206 = vector.broadcast %cst_65 : f32 to vector<8x32xf32>
    %c0_i32_66 = arith.constant 0 : i32
    %c8_i32_67 = arith.constant 8 : i32
    %207 = arith.muli %c0_i32_66, %c8_i32_67 : i32
    %208 = tpu.assume_multiple %207, 8 : i32
    %209 = arith.index_cast %208 : i32 to index
    %c0_68 = arith.constant 0 : index
    %210 = vector.load %arg6[%209, %c0_68] : memref<64x128xf32, #tpu.memory_space<vmem>>, vector<8x128xf32>
    %cst_69 = arith.constant dense<0.000000e+00> : vector<8x128xf32>
    %211 = tpu.matmul %206, %3, %cst_69 {dimension_numbers = #tpu.dot_dimension_numbers<[1], [0], [0], [1], [0, 0, 1, 1], [], []>} : vector<8x32xf32>, vector<32x128xf32>, vector<8x128xf32> -> vector<8x128xf32>
    %212 = arith.addf %210, %211 : vector<8x128xf32>
    %213 = math.tanh %212 : vector<8x128xf32>
    %cst_70 = arith.constant 5.000000e-01 : f32
    %214 = vector.broadcast %cst_70 : f32 to vector<8x128xf32>
    %215 = arith.mulf %214, %213 : vector<8x128xf32>
    %cst_71 = arith.constant 5.000000e-01 : f32
    %216 = vector.broadcast %cst_71 : f32 to vector<8x128xf32>
    %217 = arith.addf %215, %216 : vector<8x128xf32>
    %218 = arith.select %15, %213, %217 : vector<8x128xi1>, vector<8x128xf32>
    %219 = vector.extract_strided_slice %218 {offsets = [0, 0], sizes = [8, 32], strides = [1, 1]} : vector<8x128xf32> to vector<8x32xf32>
    %220 = vector.extract_strided_slice %218 {offsets = [0, 32], sizes = [8, 32], strides = [1, 1]} : vector<8x128xf32> to vector<8x32xf32>
    %221 = vector.extract_strided_slice %218 {offsets = [0, 64], sizes = [8, 32], strides = [1, 1]} : vector<8x128xf32> to vector<8x32xf32>
    %222 = vector.extract_strided_slice %218 {offsets = [0, 96], sizes = [8, 32], strides = [1, 1]} : vector<8x128xf32> to vector<8x32xf32>
    %223 = arith.mulf %220, %206 : vector<8x32xf32>
    %224 = arith.mulf %219, %221 : vector<8x32xf32>
    %225 = arith.addf %223, %224 : vector<8x32xf32>
    %226 = math.tanh %225 : vector<8x32xf32>
    %227 = arith.mulf %222, %226 : vector<8x32xf32>
    %228 = arith.index_cast %208 : i32 to index
    %c0_72 = arith.constant 0 : index
    %229 = vector.load %arg7[%228, %c0_72] : memref<64x32xf32, #tpu.memory_space<vmem>>, vector<8x32xf32>
    tpu.vector_store %arg7[%228, %c0_72], %227 {strides = array<i32>} : memref<64x32xf32, #tpu.memory_space<vmem>>, vector<8x32xf32>,
    %c1_i32_73 = arith.constant 1 : i32
    %c8_i32_74 = arith.constant 8 : i32
    %230 = arith.muli %c1_i32_73, %c8_i32_74 : i32
    %231 = tpu.assume_multiple %230, 8 : i32
    %232 = arith.index_cast %231 : i32 to index
    %c0_75 = arith.constant 0 : index
    %233 = vector.load %arg6[%232, %c0_75] : memref<64x128xf32, #tpu.memory_space<vmem>>, vector<8x128xf32>
    %cst_76 = arith.constant dense<0.000000e+00> : vector<8x128xf32>
    %234 = tpu.matmul %227, %3, %cst_76 {dimension_numbers = #tpu.dot_dimension_numbers<[1], [0], [0], [1], [0, 0, 1, 1], [], []>} : vector<8x32xf32>, vector<32x128xf32>, vector<8x128xf32> -> vector<8x128xf32>
    %235 = arith.addf %233, %234 : vector<8x128xf32>
    %236 = math.tanh %235 : vector<8x128xf32>
    %cst_77 = arith.constant 5.000000e-01 : f32
    %237 = vector.broadcast %cst_77 : f32 to vector<8x128xf32>
    %238 = arith.mulf %237, %236 : vector<8x128xf32>
    %cst_78 = arith.constant 5.000000e-01 : f32
    %239 = vector.broadcast %cst_78 : f32 to vector<8x128xf32>
    %240 = arith.addf %238, %239 : vector<8x128xf32>
    %241 = arith.select %15, %236, %240 : vector<8x128xi1>, vector<8x128xf32>
    %242 = vector.extract_strided_slice %241 {offsets = [0, 0], sizes = [8, 32], strides = [1, 1]} : vector<8x128xf32> to vector<8x32xf32>
    %243 = vector.extract_strided_slice %241 {offsets = [0, 32], sizes = [8, 32], strides = [1, 1]} : vector<8x128xf32> to vector<8x32xf32>
    %244 = vector.extract_strided_slice %241 {offsets = [0, 64], sizes = [8, 32], strides = [1, 1]} : vector<8x128xf32> to vector<8x32xf32>
    %245 = vector.extract_strided_slice %241 {offsets = [0, 96], sizes = [8, 32], strides = [1, 1]} : vector<8x128xf32> to vector<8x32xf32>
    %246 = arith.mulf %243, %225 : vector<8x32xf32>
    %247 = arith.mulf %242, %244 : vector<8x32xf32>
    %248 = arith.addf %246, %247 : vector<8x32xf32>
    %249 = math.tanh %248 : vector<8x32xf32>
    %250 = arith.mulf %245, %249 : vector<8x32xf32>
    %251 = arith.index_cast %231 : i32 to index
    %c0_79 = arith.constant 0 : index
    %252 = vector.load %arg7[%251, %c0_79] : memref<64x32xf32, #tpu.memory_space<vmem>>, vector<8x32xf32>
    tpu.vector_store %arg7[%251, %c0_79], %250 {strides = array<i32>} : memref<64x32xf32, #tpu.memory_space<vmem>>, vector<8x32xf32>,
    %c2_i32_80 = arith.constant 2 : i32
    %c8_i32_81 = arith.constant 8 : i32
    %253 = arith.muli %c2_i32_80, %c8_i32_81 : i32
    %254 = tpu.assume_multiple %253, 8 : i32
    %255 = arith.index_cast %254 : i32 to index
    %c0_82 = arith.constant 0 : index
    %256 = vector.load %arg6[%255, %c0_82] : memref<64x128xf32, #tpu.memory_space<vmem>>, vector<8x128xf32>
    %cst_83 = arith.constant dense<0.000000e+00> : vector<8x128xf32>
    %257 = tpu.matmul %250, %3, %cst_83 {dimension_numbers = #tpu.dot_dimension_numbers<[1], [0], [0], [1], [0, 0, 1, 1], [], []>} : vector<8x32xf32>, vector<32x128xf32>, vector<8x128xf32> -> vector<8x128xf32>
    %258 = arith.addf %256, %257 : vector<8x128xf32>
    %259 = math.tanh %258 : vector<8x128xf32>
    %cst_84 = arith.constant 5.000000e-01 : f32
    %260 = vector.broadcast %cst_84 : f32 to vector<8x128xf32>
    %261 = arith.mulf %260, %259 : vector<8x128xf32>
    %cst_85 = arith.constant 5.000000e-01 : f32
    %262 = vector.broadcast %cst_85 : f32 to vector<8x128xf32>
    %263 = arith.addf %261, %262 : vector<8x128xf32>
    %264 = arith.select %15, %259, %263 : vector<8x128xi1>, vector<8x128xf32>
    %265 = vector.extract_strided_slice %264 {offsets = [0, 0], sizes = [8, 32], strides = [1, 1]} : vector<8x128xf32> to vector<8x32xf32>
    %266 = vector.extract_strided_slice %264 {offsets = [0, 32], sizes = [8, 32], strides = [1, 1]} : vector<8x128xf32> to vector<8x32xf32>
    %267 = vector.extract_strided_slice %264 {offsets = [0, 64], sizes = [8, 32], strides = [1, 1]} : vector<8x128xf32> to vector<8x32xf32>
    %268 = vector.extract_strided_slice %264 {offsets = [0, 96], sizes = [8, 32], strides = [1, 1]} : vector<8x128xf32> to vector<8x32xf32>
    %269 = arith.mulf %266, %248 : vector<8x32xf32>
    %270 = arith.mulf %265, %267 : vector<8x32xf32>
    %271 = arith.addf %269, %270 : vector<8x32xf32>
    %272 = math.tanh %271 : vector<8x32xf32>
    %273 = arith.mulf %268, %272 : vector<8x32xf32>
    %274 = arith.index_cast %254 : i32 to index
    %c0_86 = arith.constant 0 : index
    %275 = vector.load %arg7[%274, %c0_86] : memref<64x32xf32, #tpu.memory_space<vmem>>, vector<8x32xf32>
    tpu.vector_store %arg7[%274, %c0_86], %273 {strides = array<i32>} : memref<64x32xf32, #tpu.memory_space<vmem>>, vector<8x32xf32>,
    %c3_i32_87 = arith.constant 3 : i32
    %c8_i32_88 = arith.constant 8 : i32
    %276 = arith.muli %c3_i32_87, %c8_i32_88 : i32
    %277 = tpu.assume_multiple %276, 8 : i32
    %278 = arith.index_cast %277 : i32 to index
    %c0_89 = arith.constant 0 : index
    %279 = vector.load %arg6[%278, %c0_89] : memref<64x128xf32, #tpu.memory_space<vmem>>, vector<8x128xf32>
    %cst_90 = arith.constant dense<0.000000e+00> : vector<8x128xf32>
    %280 = tpu.matmul %273, %3, %cst_90 {dimension_numbers = #tpu.dot_dimension_numbers<[1], [0], [0], [1], [0, 0, 1, 1], [], []>} : vector<8x32xf32>, vector<32x128xf32>, vector<8x128xf32> -> vector<8x128xf32>
    %281 = arith.addf %279, %280 : vector<8x128xf32>
    %282 = math.tanh %281 : vector<8x128xf32>
    %cst_91 = arith.constant 5.000000e-01 : f32
    %283 = vector.broadcast %cst_91 : f32 to vector<8x128xf32>
    %284 = arith.mulf %283, %282 : vector<8x128xf32>
    %cst_92 = arith.constant 5.000000e-01 : f32
    %285 = vector.broadcast %cst_92 : f32 to vector<8x128xf32>
    %286 = arith.addf %284, %285 : vector<8x128xf32>
    %287 = arith.select %15, %282, %286 : vector<8x128xi1>, vector<8x128xf32>
    %288 = vector.extract_strided_slice %287 {offsets = [0, 0], sizes = [8, 32], strides = [1, 1]} : vector<8x128xf32> to vector<8x32xf32>
    %289 = vector.extract_strided_slice %287 {offsets = [0, 32], sizes = [8, 32], strides = [1, 1]} : vector<8x128xf32> to vector<8x32xf32>
    %290 = vector.extract_strided_slice %287 {offsets = [0, 64], sizes = [8, 32], strides = [1, 1]} : vector<8x128xf32> to vector<8x32xf32>
    %291 = vector.extract_strided_slice %287 {offsets = [0, 96], sizes = [8, 32], strides = [1, 1]} : vector<8x128xf32> to vector<8x32xf32>
    %292 = arith.mulf %289, %271 : vector<8x32xf32>
    %293 = arith.mulf %288, %290 : vector<8x32xf32>
    %294 = arith.addf %292, %293 : vector<8x32xf32>
    %295 = math.tanh %294 : vector<8x32xf32>
    %296 = arith.mulf %291, %295 : vector<8x32xf32>
    %297 = arith.index_cast %277 : i32 to index
    %c0_93 = arith.constant 0 : index
    %298 = vector.load %arg7[%297, %c0_93] : memref<64x32xf32, #tpu.memory_space<vmem>>, vector<8x32xf32>
    tpu.vector_store %arg7[%297, %c0_93], %296 {strides = array<i32>} : memref<64x32xf32, #tpu.memory_space<vmem>>, vector<8x32xf32>,
    %c4_i32_94 = arith.constant 4 : i32
    %c8_i32_95 = arith.constant 8 : i32
    %299 = arith.muli %c4_i32_94, %c8_i32_95 : i32
    %300 = tpu.assume_multiple %299, 8 : i32
    %301 = arith.index_cast %300 : i32 to index
    %c0_96 = arith.constant 0 : index
    %302 = vector.load %arg6[%301, %c0_96] : memref<64x128xf32, #tpu.memory_space<vmem>>, vector<8x128xf32>
    %cst_97 = arith.constant dense<0.000000e+00> : vector<8x128xf32>
    %303 = tpu.matmul %296, %3, %cst_97 {dimension_numbers = #tpu.dot_dimension_numbers<[1], [0], [0], [1], [0, 0, 1, 1], [], []>} : vector<8x32xf32>, vector<32x128xf32>, vector<8x128xf32> -> vector<8x128xf32>
    %304 = arith.addf %302, %303 : vector<8x128xf32>
    %305 = math.tanh %304 : vector<8x128xf32>
    %cst_98 = arith.constant 5.000000e-01 : f32
    %306 = vector.broadcast %cst_98 : f32 to vector<8x128xf32>
    %307 = arith.mulf %306, %305 : vector<8x128xf32>
    %cst_99 = arith.constant 5.000000e-01 : f32
    %308 = vector.broadcast %cst_99 : f32 to vector<8x128xf32>
    %309 = arith.addf %307, %308 : vector<8x128xf32>
    %310 = arith.select %15, %305, %309 : vector<8x128xi1>, vector<8x128xf32>
    %311 = vector.extract_strided_slice %310 {offsets = [0, 0], sizes = [8, 32], strides = [1, 1]} : vector<8x128xf32> to vector<8x32xf32>
    %312 = vector.extract_strided_slice %310 {offsets = [0, 32], sizes = [8, 32], strides = [1, 1]} : vector<8x128xf32> to vector<8x32xf32>
    %313 = vector.extract_strided_slice %310 {offsets = [0, 64], sizes = [8, 32], strides = [1, 1]} : vector<8x128xf32> to vector<8x32xf32>
    %314 = vector.extract_strided_slice %310 {offsets = [0, 96], sizes = [8, 32], strides = [1, 1]} : vector<8x128xf32> to vector<8x32xf32>
    %315 = arith.mulf %312, %294 : vector<8x32xf32>
    %316 = arith.mulf %311, %313 : vector<8x32xf32>
    %317 = arith.addf %315, %316 : vector<8x32xf32>
    %318 = math.tanh %317 : vector<8x32xf32>
    %319 = arith.mulf %314, %318 : vector<8x32xf32>
    %320 = arith.index_cast %300 : i32 to index
    %c0_100 = arith.constant 0 : index
    %321 = vector.load %arg7[%320, %c0_100] : memref<64x32xf32, #tpu.memory_space<vmem>>, vector<8x32xf32>
    tpu.vector_store %arg7[%320, %c0_100], %319 {strides = array<i32>} : memref<64x32xf32, #tpu.memory_space<vmem>>, vector<8x32xf32>,
    %c5_i32_101 = arith.constant 5 : i32
    %c8_i32_102 = arith.constant 8 : i32
    %322 = arith.muli %c5_i32_101, %c8_i32_102 : i32
    %323 = tpu.assume_multiple %322, 8 : i32
    %324 = arith.index_cast %323 : i32 to index
    %c0_103 = arith.constant 0 : index
    %325 = vector.load %arg6[%324, %c0_103] : memref<64x128xf32, #tpu.memory_space<vmem>>, vector<8x128xf32>
    %cst_104 = arith.constant dense<0.000000e+00> : vector<8x128xf32>
    %326 = tpu.matmul %319, %3, %cst_104 {dimension_numbers = #tpu.dot_dimension_numbers<[1], [0], [0], [1], [0, 0, 1, 1], [], []>} : vector<8x32xf32>, vector<32x128xf32>, vector<8x128xf32> -> vector<8x128xf32>
    %327 = arith.addf %325, %326 : vector<8x128xf32>
    %328 = math.tanh %327 : vector<8x128xf32>
    %cst_105 = arith.constant 5.000000e-01 : f32
    %329 = vector.broadcast %cst_105 : f32 to vector<8x128xf32>
    %330 = arith.mulf %329, %328 : vector<8x128xf32>
    %cst_106 = arith.constant 5.000000e-01 : f32
    %331 = vector.broadcast %cst_106 : f32 to vector<8x128xf32>
    %332 = arith.addf %330, %331 : vector<8x128xf32>
    %333 = arith.select %15, %328, %332 : vector<8x128xi1>, vector<8x128xf32>
    %334 = vector.extract_strided_slice %333 {offsets = [0, 0], sizes = [8, 32], strides = [1, 1]} : vector<8x128xf32> to vector<8x32xf32>
    %335 = vector.extract_strided_slice %333 {offsets = [0, 32], sizes = [8, 32], strides = [1, 1]} : vector<8x128xf32> to vector<8x32xf32>
    %336 = vector.extract_strided_slice %333 {offsets = [0, 64], sizes = [8, 32], strides = [1, 1]} : vector<8x128xf32> to vector<8x32xf32>
    %337 = vector.extract_strided_slice %333 {offsets = [0, 96], sizes = [8, 32], strides = [1, 1]} : vector<8x128xf32> to vector<8x32xf32>
    %338 = arith.mulf %335, %317 : vector<8x32xf32>
    %339 = arith.mulf %334, %336 : vector<8x32xf32>
    %340 = arith.addf %338, %339 : vector<8x32xf32>
    %341 = math.tanh %340 : vector<8x32xf32>
    %342 = arith.mulf %337, %341 : vector<8x32xf32>
    %343 = arith.index_cast %323 : i32 to index
    %c0_107 = arith.constant 0 : index
    %344 = vector.load %arg7[%343, %c0_107] : memref<64x32xf32, #tpu.memory_space<vmem>>, vector<8x32xf32>
    tpu.vector_store %arg7[%343, %c0_107], %342 {strides = array<i32>} : memref<64x32xf32, #tpu.memory_space<vmem>>, vector<8x32xf32>,
    %c6_i32_108 = arith.constant 6 : i32
    %c8_i32_109 = arith.constant 8 : i32
    %345 = arith.muli %c6_i32_108, %c8_i32_109 : i32
    %346 = tpu.assume_multiple %345, 8 : i32
    %347 = arith.index_cast %346 : i32 to index
    %c0_110 = arith.constant 0 : index
    %348 = vector.load %arg6[%347, %c0_110] : memref<64x128xf32, #tpu.memory_space<vmem>>, vector<8x128xf32>
    %cst_111 = arith.constant dense<0.000000e+00> : vector<8x128xf32>
    %349 = tpu.matmul %342, %3, %cst_111 {dimension_numbers = #tpu.dot_dimension_numbers<[1], [0], [0], [1], [0, 0, 1, 1], [], []>} : vector<8x32xf32>, vector<32x128xf32>, vector<8x128xf32> -> vector<8x128xf32>
    %350 = arith.addf %348, %349 : vector<8x128xf32>
    %351 = math.tanh %350 : vector<8x128xf32>
    %cst_112 = arith.constant 5.000000e-01 : f32
    %352 = vector.broadcast %cst_112 : f32 to vector<8x128xf32>
    %353 = arith.mulf %352, %351 : vector<8x128xf32>
    %cst_113 = arith.constant 5.000000e-01 : f32
    %354 = vector.broadcast %cst_113 : f32 to vector<8x128xf32>
    %355 = arith.addf %353, %354 : vector<8x128xf32>
    %356 = arith.select %15, %351, %355 : vector<8x128xi1>, vector<8x128xf32>
    %357 = vector.extract_strided_slice %356 {offsets = [0, 0], sizes = [8, 32], strides = [1, 1]} : vector<8x128xf32> to vector<8x32xf32>
    %358 = vector.extract_strided_slice %356 {offsets = [0, 32], sizes = [8, 32], strides = [1, 1]} : vector<8x128xf32> to vector<8x32xf32>
    %359 = vector.extract_strided_slice %356 {offsets = [0, 64], sizes = [8, 32], strides = [1, 1]} : vector<8x128xf32> to vector<8x32xf32>
    %360 = vector.extract_strided_slice %356 {offsets = [0, 96], sizes = [8, 32], strides = [1, 1]} : vector<8x128xf32> to vector<8x32xf32>
    %361 = arith.mulf %358, %340 : vector<8x32xf32>
    %362 = arith.mulf %357, %359 : vector<8x32xf32>
    %363 = arith.addf %361, %362 : vector<8x32xf32>
    %364 = math.tanh %363 : vector<8x32xf32>
    %365 = arith.mulf %360, %364 : vector<8x32xf32>
    %366 = arith.index_cast %346 : i32 to index
    %c0_114 = arith.constant 0 : index
    %367 = vector.load %arg7[%366, %c0_114] : memref<64x32xf32, #tpu.memory_space<vmem>>, vector<8x32xf32>
    tpu.vector_store %arg7[%366, %c0_114], %365 {strides = array<i32>} : memref<64x32xf32, #tpu.memory_space<vmem>>, vector<8x32xf32>,
    %c7_i32_115 = arith.constant 7 : i32
    %c8_i32_116 = arith.constant 8 : i32
    %368 = arith.muli %c7_i32_115, %c8_i32_116 : i32
    %369 = tpu.assume_multiple %368, 8 : i32
    %370 = arith.index_cast %369 : i32 to index
    %c0_117 = arith.constant 0 : index
    %371 = vector.load %arg6[%370, %c0_117] : memref<64x128xf32, #tpu.memory_space<vmem>>, vector<8x128xf32>
    %cst_118 = arith.constant dense<0.000000e+00> : vector<8x128xf32>
    %372 = tpu.matmul %365, %3, %cst_118 {dimension_numbers = #tpu.dot_dimension_numbers<[1], [0], [0], [1], [0, 0, 1, 1], [], []>} : vector<8x32xf32>, vector<32x128xf32>, vector<8x128xf32> -> vector<8x128xf32>
    %373 = arith.addf %371, %372 : vector<8x128xf32>
    %374 = math.tanh %373 : vector<8x128xf32>
    %cst_119 = arith.constant 5.000000e-01 : f32
    %375 = vector.broadcast %cst_119 : f32 to vector<8x128xf32>
    %376 = arith.mulf %375, %374 : vector<8x128xf32>
    %cst_120 = arith.constant 5.000000e-01 : f32
    %377 = vector.broadcast %cst_120 : f32 to vector<8x128xf32>
    %378 = arith.addf %376, %377 : vector<8x128xf32>
    %379 = arith.select %15, %374, %378 : vector<8x128xi1>, vector<8x128xf32>
    %380 = vector.extract_strided_slice %379 {offsets = [0, 0], sizes = [8, 32], strides = [1, 1]} : vector<8x128xf32> to vector<8x32xf32>
    %381 = vector.extract_strided_slice %379 {offsets = [0, 32], sizes = [8, 32], strides = [1, 1]} : vector<8x128xf32> to vector<8x32xf32>
    %382 = vector.extract_strided_slice %379 {offsets = [0, 64], sizes = [8, 32], strides = [1, 1]} : vector<8x128xf32> to vector<8x32xf32>
    %383 = vector.extract_strided_slice %379 {offsets = [0, 96], sizes = [8, 32], strides = [1, 1]} : vector<8x128xf32> to vector<8x32xf32>
    %384 = arith.mulf %381, %363 : vector<8x32xf32>
    %385 = arith.mulf %380, %382 : vector<8x32xf32>
    %386 = arith.addf %384, %385 : vector<8x32xf32>
    %387 = math.tanh %386 : vector<8x32xf32>
    %388 = arith.mulf %383, %387 : vector<8x32xf32>
    %389 = arith.index_cast %369 : i32 to index
    %c0_121 = arith.constant 0 : index
    %390 = vector.load %arg7[%389, %c0_121] : memref<64x32xf32, #tpu.memory_space<vmem>>, vector<8x32xf32>
    tpu.vector_store %arg7[%389, %c0_121], %388 {strides = array<i32>} : memref<64x32xf32, #tpu.memory_space<vmem>>, vector<8x32xf32>,
    %c8_i32_122 = arith.constant 8 : i32
    %c0_123 = arith.constant 0 : index
    %c0_124 = arith.constant 0 : index
    %391 = vector.load %arg3[%c0_123, %c0_124] : memref<40x96xf32, #tpu.memory_space<vmem>>, vector<32x96xf32>
    %c32 = arith.constant 32 : index
    %c0_125 = arith.constant 0 : index
    %392 = vector.load %arg3[%c32, %c0_125] : memref<40x96xf32, #tpu.memory_space<vmem>>, vector<1x96xf32>
    %c0_126 = arith.constant 0 : index
    %c0_127 = arith.constant 0 : index
    %393 = vector.load %arg7[%c0_126, %c0_127] : memref<64x32xf32, #tpu.memory_space<vmem>>, vector<64x32xf32>
    %cst_128 = arith.constant dense<0.000000e+00> : vector<64x96xf32>
    %394 = tpu.matmul %393, %391, %cst_128 {dimension_numbers = #tpu.dot_dimension_numbers<[1], [0], [0], [1], [0, 0, 1, 1], [], []>} : vector<64x32xf32>, vector<32x96xf32>, vector<64x96xf32> -> vector<64x96xf32>
    %395 = vector.broadcast %392 : vector<1x96xf32> to vector<64x96xf32>
    %396 = arith.addf %394, %395 : vector<64x96xf32>
    %397 = vector.extract_strided_slice %396 {offsets = [56, 0], sizes = [8, 32], strides = [1, 1]} : vector<64x96xf32> to vector<8x32xf32>
    %cst_129 = arith.constant 0.353553385 : f32
    %398 = vector.broadcast %cst_129 : f32 to vector<8x32xf32>
    %399 = arith.mulf %397, %398 : vector<8x32xf32>
    %400 = vector.extract_strided_slice %396 {offsets = [0, 32], sizes = [64, 32], strides = [1, 1]} : vector<64x96xf32> to vector<64x32xf32>
    %401 = vector.shape_cast %400 : vector<64x32xf32> to vector<8x8x32xf32>
    %402 = vector.extract_strided_slice %396 {offsets = [0, 64], sizes = [64, 32], strides = [1, 1]} : vector<64x96xf32> to vector<64x32xf32>
    %403 = vector.shape_cast %402 : vector<64x32xf32> to vector<8x8x32xf32>
    %404 = tpu.iota {dimensions = array<i32: 0>} : vector<32x4xi32>
    %405 = tpu.iota {dimensions = array<i32: 1>} : vector<32x4xi32>
    %c8_i32_130 = arith.constant 8 : i32
    %406 = vector.broadcast %c8_i32_130 : i32 to vector<32x4xi32>
    %407 = arith.muli %405, %406 : vector<32x4xi32>
    %408 = arith.cmpi sge, %404, %407 : vector<32x4xi32>
    %c1_i32_131 = arith.constant 1 : i32
    %409 = vector.broadcast %c1_i32_131 : i32 to vector<32x4xi32>
    %410 = arith.addi %405, %409 : vector<32x4xi32>
    %c8_i32_132 = arith.constant 8 : i32
    %411 = vector.broadcast %c8_i32_132 : i32 to vector<32x4xi32>
    %412 = arith.muli %410, %411 : vector<32x4xi32>
    %413 = arith.cmpi slt, %404, %412 : vector<32x4xi32>
    %414 = arith.andi %408, %413 : vector<32x4xi1>
    %cst_133 = arith.constant 1.000000e+00 : f32
    %cst_134 = arith.constant 0.000000e+00 : f32
    %415 = vector.broadcast %cst_133 : f32 to vector<32x4xf32>
    %416 = vector.broadcast %cst_134 : f32 to vector<32x4xf32>
    %417 = arith.select %414, %415, %416 : vector<32x4xi1>, vector<32x4xf32>
    %418 = tpu.iota {dimensions = array<i32: 0>} : vector<4x32xi32>
    %419 = tpu.iota {dimensions = array<i32: 1>} : vector<4x32xi32>
    %c8_i32_135 = arith.constant 8 : i32
    %420 = vector.broadcast %c8_i32_135 : i32 to vector<4x32xi32>
    %421 = arith.muli %418, %420 : vector<4x32xi32>
    %422 = arith.cmpi sge, %419, %421 : vector<4x32xi32>
    %c1_i32_136 = arith.constant 1 : i32
    %423 = vector.broadcast %c1_i32_136 : i32 to vector<4x32xi32>
    %424 = arith.addi %418, %423 : vector<4x32xi32>
    %c8_i32_137 = arith.constant 8 : i32
    %425 = vector.broadcast %c8_i32_137 : i32 to vector<4x32xi32>
    %426 = arith.muli %424, %425 : vector<4x32xi32>
    %427 = arith.cmpi slt, %419, %426 : vector<4x32xi32>
    %428 = arith.andi %422, %427 : vector<4x32xi1>
    %cst_138 = arith.constant 1.000000e+00 : f32
    %cst_139 = arith.constant 0.000000e+00 : f32
    %429 = vector.broadcast %cst_138 : f32 to vector<4x32xf32>
    %430 = vector.broadcast %cst_139 : f32 to vector<4x32xf32>
    %431 = arith.select %428, %429, %430 : vector<4x32xi1>, vector<4x32xf32>
    %432 = vector.shape_cast %399 : vector<8x32xf32> to vector<1x8x32xf32>
    %433 = vector.broadcast %432 : vector<1x8x32xf32> to vector<8x8x32xf32>
    %434 = arith.mulf %433, %401 : vector<8x8x32xf32>
    %435 = vector.shape_cast %434 : vector<8x8x32xf32> to vector<64x32xf32>
    %cst_140 = arith.constant dense<0.000000e+00> : vector<64x4xf32>
    %436 = tpu.matmul %435, %417, %cst_140 {dimension_numbers = #tpu.dot_dimension_numbers<[1], [0], [0], [1], [0, 0, 1, 1], [], []>} : vector<64x32xf32>, vector<32x4xf32>, vector<64x4xf32> -> vector<64x4xf32>
    %437 = vector.shape_cast %436 : vector<64x4xf32> to vector<8x8x4xf32>
    %cst_141 = arith.constant dense<0xFF800000> : vector<8x4xf32>
    %438 = vector.multi_reduction <maximumf>, %437, %cst_141 [0] : vector<8x8x4xf32> to vector<8x4xf32>
    %439 = vector.shape_cast %438 : vector<8x4xf32> to vector<1x8x4xf32>
    %440 = vector.broadcast %439 : vector<1x8x4xf32> to vector<8x8x4xf32>
    %441 = arith.subf %437, %440 : vector<8x8x4xf32>
    %442 = math.exp %441 : vector<8x8x4xf32>
    %cst_142 = arith.constant dense<0.000000e+00> : vector<8x4xf32>
    %443 = vector.multi_reduction <add>, %442, %cst_142 [0] : vector<8x8x4xf32> to vector<8x4xf32>
    %444 = vector.shape_cast %443 : vector<8x4xf32> to vector<1x8x4xf32>
    %445 = tpu.reciprocal %444 {approx = true} : vector<1x8x4xf32> -> vector<1x8x4xf32>
    %446 = arith.mulf %444, %445 : vector<1x8x4xf32>
    %cst_143 = arith.constant 2.000000e+00 : f32
    %447 = vector.broadcast %cst_143 : f32 to vector<1x8x4xf32>
    %448 = arith.subf %447, %446 : vector<1x8x4xf32>
    %449 = arith.mulf %445, %448 : vector<1x8x4xf32>
    %450 = vector.broadcast %449 : vector<1x8x4xf32> to vector<8x8x4xf32>
    %451 = arith.mulf %442, %450 : vector<8x8x4xf32>
    %452 = vector.shape_cast %451 : vector<8x8x4xf32> to vector<64x4xf32>
    %cst_144 = arith.constant dense<0.000000e+00> : vector<64x32xf32>
    %453 = tpu.matmul %452, %431, %cst_144 {dimension_numbers = #tpu.dot_dimension_numbers<[1], [0], [0], [1], [0, 0, 1, 1], [], []>} : vector<64x4xf32>, vector<4x32xf32>, vector<64x32xf32> -> vector<64x32xf32>
    %454 = vector.shape_cast %453 : vector<64x32xf32> to vector<8x8x32xf32>
    %455 = arith.mulf %454, %403 : vector<8x8x32xf32>
    %cst_145 = arith.constant dense<0.000000e+00> : vector<8x32xf32>
    %456 = vector.multi_reduction <add>, %455, %cst_145 [0] : vector<8x8x32xf32> to vector<8x32xf32>
    %c0_146 = arith.constant 0 : index
    %c0_147 = arith.constant 0 : index
    %457 = vector.load %arg4[%c0_146, %c0_147] : memref<40x1xf32, #tpu.memory_space<vmem>>, vector<32x1xf32>
    %c32_148 = arith.constant 32 : index
    %c0_149 = arith.constant 0 : index
    %458 = vector.load %arg4[%c32_148, %c0_149] : memref<40x1xf32, #tpu.memory_space<vmem>>, vector<1x1xf32>
    %cst_150 = arith.constant dense<0.000000e+00> : vector<8x1xf32>
    %459 = tpu.matmul %456, %457, %cst_150 {dimension_numbers = #tpu.dot_dimension_numbers<[1], [0], [0], [1], [0, 0, 1, 1], [], []>} : vector<8x32xf32>, vector<32x1xf32>, vector<8x1xf32> -> vector<8x1xf32>
    %460 = vector.broadcast %458 : vector<1x1xf32> to vector<8x1xf32>
    %461 = arith.addf %459, %460 : vector<8x1xf32>
    %c0_151 = arith.constant 0 : index
    %c0_152 = arith.constant 0 : index
    %462 = vector.load %arg5[%c0_151, %c0_152] : memref<8x1xf32, #tpu.memory_space<vmem>>, vector<8x1xf32>
    tpu.vector_store %arg5[%c0_151, %c0_152], %461 {strides = array<i32>} : memref<8x1xf32, #tpu.memory_space<vmem>>, vector<8x1xf32>,
    return
  }
}

</mosaic_0001>

<bundles_post_ra>
// kernel: tft_forward.1
= control target key start
LH: loop header
LB: loop body
LE: loop exit
PB: predicated region body
PF: predicated region fallthrough
CT: control target
= control target key end

     0   :  { %vm50_vm0 = vcmask 64512   ;;  %v3332_v8 = vmov 0.0|0.0   ;;  %vm3333_vm1 = vmmov 0   ;;  %v3334_v14 = vmov 0.0   ;;  %s3335_s17 = smov 64   ;;  %s3336_s18 = smov 32   ;;  %s3892_s2 = inlined_call_operand.vmem [shape: f32[112,128], index: 2, kind: input, shape index: {}]   ;;  %s3893_s0 = inlined_call_operand.vmem [shape: f32[64,8], index: 0, kind: input, shape index: {}]   ;;  %s3894_s1 = inlined_call_operand.vmem [shape: f32[64,128], index: 1, kind: input, shape index: {}]   ;;  %s3895_s3 = inlined_call_operand.vmem [shape: f32[40,96], index: 3, kind: input, shape index: {}]   ;;  %s3896_s4 = inlined_call_operand.vmem [shape: f32[40,1], index: 4, kind: input, shape index: {}]   ;;  %s3897_s5 = inlined_call_operand.vmem [shape: f32[8,1], index: 5, kind: output, shape index: {}]  }
   0x1   :  { %v20_v0 = vld [vmem:[%s3892_s2] sm:$0xff]  ;;  %v39_v2 = vld [vmem:[%s3893_s0 + $0x28] sm:$0xff]  ;;  %v22_v4 = vld [vmem:[%s3892_s2 + $0x10] sm:$0xff]  ;;  %v188_v26 = vlaneseq  ;;  %vm194_vm5 = vcmask 261120   ;;  %s3337_s13 = smov 96  }
   0x2   :  { %v38_v1 = vld [vmem:[%s3893_s0 + $0x20] sm:$0xff]  ;;  %3241 = vmatprep.subr.mxu1 %v20_v0  ;;  %v21_v3 = vld [vmem:[%s3892_s2 + $0x8] sm:$0xff]  ;;  %v40_v5 = vld [vmem:[%s3893_s0 + $0x30] sm:$0xff]  ;;  %2840 = vmatprep.subr.mxu0 %v20_v0 }
   0x3   :  { %2848 = vmatprep.mubr.msk.f32.mxu1 %vm50_vm0, %v38_v1  ;;  %3242 = vmatpush3.msra.mxu1 %v20_v0  ;;  %v3388_v6 = vpack.c.bf16 %v22_v4, %v21_v3  ;;  %v34_v7 = vld [vmem:[%s3893_s0] sm:$0xff]  ;;  %v35_v9 = vld [vmem:[%s3893_s0 + $0x8] sm:$0xff]  ;;  %v23_v10 = vld [vmem:[%s3892_s2 + $0x18] sm:$0xff]  ;;  %v3443_v27 = vand.u32 127, %v188_v26 }
   0x4   :  { %2849 = vmatmul.mubr.msk.f32.vlgmr.msra.gmra.mrb[0].mxu1 %vm50_vm0, %v39_v2  ;;  %3115 = vmatprep.subr.bf16.mxu1 %v3332_v8  ;;  %v24_v11 = vld [vmem:[%s3892_s2 + $0x20] sm:$0xff]  ;;  %v41_v12 = vld [vmem:[%s3893_s0 + $0x38] sm:$0xff]  ;;  %v43_v42 = vld [vmem:[%s3894_s1 + $0x8] sm:$0xff] }
   0x5   :  { %3117 = vmatpush3.bf16.msra.mxu1 %v3388_v6  ;;  %2851 = vmatprep.mubr.msk.f32.mxu1 %vm50_vm0, %v40_v5  ;;  %v3409_v13 = vpack.c.bf16 %v24_v11, %v23_v10  ;;  %v42_v17 = vld [vmem:[%s3894_s1] sm:$0xff]  ;;  %vm190_vm2 = vcmp.ge.s32.totalorder %v3443_v27, 64  ;;  %vm191_vm3 = vcmp.lt.s32.totalorder %v3443_v27, 96  ;;  %v36_v56 = vld [vmem:[%s3893_s0 + $0x10] sm:$0xff]  ;;  %v37_v57 = vld [vmem:[%s3893_s0 + $0x18] sm:$0xff] }
   0x6   :  { %2841 = vmatpush3.msra.mxu0 %v20_v0  ;;  %2842 = vmatprep.mubr.msk.f32.mxu0 %vm50_vm0, %v34_v7  ;;  %vm3447_vm4 = vmand %vm190_vm2, %vm191_vm3  ;;  %v44_v0 = vld [vmem:[%s3894_s1 + $0x10] sm:$0xff] }
   0x7   :  { %3118 = vmatprep.subr.bf16.mxu1 %v3332_v8  ;;  %2843 = vmatmul.mubr.msk.f32.vlgmr.msra.gmra.mrb[0].mxu0 %vm50_vm0, %v35_v9 }
   0x8   :  { %2852 = vmatmul.mubr.msk.f32.gmra.mrb[2].mxu1 %vm50_vm0, %v41_v12  ;;  %3127 = vmatprep.subr.bf16.mxu0 %v3332_v8 }
   0x9   :  { %3120 = vmatpush3.bf16.msra.mxu1 %v3409_v13  ;;  %2862 = vmatprep.mubr.msk.f32.mxu1 %vm3333_vm1, %v3334_v14 }
   0xa   :  { %3121 = vmatprep.subr.bf16.mxu1 %v3332_v8  ;;  %3129 = vmatpush3.bf16.msra.mxu0 %v3388_v6 }
   0xb   :  { %3130 = vmatprep.subr.bf16.mxu0 %v3332_v8  ;;  %2845 = vmatprep.mubr.msk.f32.mxu0 %vm50_vm0, %v36_v56 }
   0xc   :  { %2863 = vmatmul.mubr.f32.vlgmr.msra.gmra.mrb[4].mxu1 %v3334_v14  ;;  %2846 = vmatmul.mubr.msk.f32.gmra.mrb[2].mxu0 %vm50_vm0, %v37_v57 }
   0xd   :  { %3123 = vmatpush3.bf16.msra.mxu1 %v3388_v6  ;;  %2873 = vmatprep.mubr.msk.f32.mxu1 %vm3333_vm1, %v3334_v14 }
   0xe   :  { %3124 = vmatprep.subr.bf16.mxu1 %v3332_v8  ;;  %3132 = vmatpush3.bf16.msra.mxu0 %v3409_v13 }
   0xf   :  { %3139 = vmatprep.subr.bf16.mxu0 %v3332_v8  ;;  %2884 = vmatprep.mubr.msk.f32.mxu0 %vm3333_vm1, %v3334_v14 }
  0x11   :  { %3126 = vmatpush3.bf16.msra.mxu1 %v3409_v13 }
  0x12   :  { %3133 = vmatprep.subr.bf16.mxu1 %v3332_v8 }
  0xd7   :  { %v3431_v15 = vpop.f32.mrb[0].mxu1 }
  0xd8   :  { %v3433_v16 = vpop.f32.mrb[1].mxu1 }
  0xda   :  { %v2844_v18 = vpop.f32.mrb[0].mxu0 }
  0xdb   :  { %v3438_v19 = vpop.f32.mrb[2].mxu1  ;;  %v141_v20 = vpop.f32.mrb[1].mxu0  ;;  %v147_v43 = vadd.f32 %v2844_v18, %v43_v42 }
  0xdc   :  { %v3440_v21 = vpop.f32.mrb[3].mxu1  ;;  %v142_v22 = vadd.f32 %v141_v20, %v42_v17 }
  0xdf   :  { %v264_v23 = vpop.f32.mrb[4].mxu1  ;;  %v2847_v61 = vpop.f32.mrb[2].mxu0 }
  0xe0   :  { %v268_v24 = vadd.f32 %v264_v23, %v142_v22  ;;  %v2864_v25 = vpop.f32.mrb[5].mxu1  ;;  %v151_v62 = vpop.f32.mrb[3].mxu0 }
  0xe1   :  { %v152_v1 = vadd.f32 %v151_v62, %v44_v0  ;;  %v47_v0 = vld [vmem:[%s3894_s1 + $0x28] sm:$0xff] }
  0xe2   :  { %3250 = vtanh.f32 %v268_v24 }
  0xec   :  { %v3251_v28 = vpop.eup %3250 }
  0xed   :  { %v270_v29 = vmul.f32 0.5, %v3251_v28 }
  0xef   :  { %v271_v31 = vadd.f32 0.5, %v270_v29 }
  0xf1   :  { %v272_v32 = vsel %vm3447_vm4, %v3251_v28, %v271_v31  ;;  %v45_v28 = vld [vmem:[%s3894_s1 + $0x18] sm:$0xff] }
  0xf2   :  { %275 = vrot.lane.b32.xlu0 %v272_v32, %s3335_s17  ;;  %v273_v35 = vmul.f32 0.0, %v272_v32  ;;  %v157_v29 = vadd.f32 %v2847_v61, %v45_v28  ;;  %v28_v28 = vld [vmem:[%s3892_s2 + $0x40] sm:$0xff] }
 0x164   :  { %v276_v33 = vpop.permute.xlu0 %275 }
 0x165   :  { %v278_v34 = vmul.f32 %v276_v33, %v272_v32 }
 0x167   :  { %280 = vrot.lane.b32.xlu0 %v278_v34, %s3336_s18 }
 0x1d9   :  { %v281_v36 = vpop.permute.xlu0 %280 }
 0x1da   :  { %v283_v37 = vadd.f32 %v281_v36, %v273_v35 }
 0x1dc   :  { %3252 = vtanh.f32 %v283_v37 }
 0x1e6   :  { %v3253_v38 = vpop.eup %3252 }
 0x1e7   :  { %286 = vrot.lane.b32.xlu1 %v3253_v38, %s3335_s17 }
 0x259   :  { %v287_v39 = vpop.permute.xlu1 %286 }
 0x25a   :  { %v289_v40 = vmul.f32 %v287_v39, %v272_v32 }
 0x25c   :  { %291 = vrot.lane.b32.xlu1 %v289_v40, %s3336_s18 }
 0x2ce   :  { %v292_v41 = vpop.permute.xlu1 %291 }
 0x2cf   :  { %294 = vst.msk [vmem:[#allocation3] sm:$0xff] %vm194_vm5, %v292_v41  ;;  %2874 = vmatmul.mubr.msk.f32.vlgmr.msra.gmra.mrb[6].mxu1 %vm194_vm5, %v292_v41 }
 0x2d0   :  { %3135 = vmatpush3.bf16.msra.mxu1 %v3388_v6  ;;  %2895 = vmatprep.mubr.msk.f32.mxu1 %vm3333_vm1, %v3334_v14 }
 0x2d1   :  { %3136 = vmatprep.subr.bf16.mxu1 %v3332_v8 }
 0x2d4   :  { %3138 = vmatpush3.bf16.msra.mxu1 %v3409_v13 }
 0x2d5   :  { %3145 = vmatprep.subr.bf16.mxu1 %v3332_v8 }
 0x3a2   :  { %v365_v44 = vpop.f32.mrb[6].mxu1 }
 0x3a3   :  { %v369_v45 = vadd.f32 %v365_v44, %v147_v43  ;;  %v2875_v46 = vpop.f32.mrb[7].mxu1 }
 0x3a5   :  { %3254 = vtanh.f32 %v369_v45 }
 0x3af   :  { %v3255_v47 = vpop.eup %3254 }
 0x3b0   :  { %v371_v48 = vmul.f32 0.5, %v3255_v47 }
 0x3b2   :  { %v372_v49 = vadd.f32 0.5, %v371_v48 }
 0x3b4   :  { %v373_v50 = vsel %vm3447_vm4, %v3255_v47, %v372_v49  ;;  %v46_v47 = vld [vmem:[%s3894_s1 + $0x20] sm:$0xff] }
 0x3b5   :  { %376 = vrot.lane.b32.xlu0 %v373_v50, %s3335_s17  ;;  %v374_v53 = vmul.f32 %v373_v50, %v283_v37  ;;  %v162_v48 = vadd.f32 %v3433_v16, %v46_v47 }
 0x427   :  { %v377_v51 = vpop.permute.xlu0 %376 }
 0x428   :  { %v379_v52 = vmul.f32 %v377_v51, %v373_v50 }
 0x42a   :  { %381 = vrot.lane.b32.xlu1 %v379_v52, %s3336_s18 }
 0x49c   :  { %v382_v54 = vpop.permute.xlu1 %381 }
 0x49d   :  { %v384_v55 = vadd.f32 %v382_v54, %v374_v53 }
 0x49f   :  { %3256 = vtanh.f32 %v384_v55 }
 0x4a9   :  { %v3257_v58 = vpop.eup %3256 }
 0x4aa   :  { %387 = vrot.lane.b32.xlu0 %v3257_v58, %s3335_s17 }
 0x51c   :  { %v388_v59 = vpop.permute.xlu0 %387 }
 0x51d   :  { %v390_v60 = vmul.f32 %v388_v59, %v373_v50 }
 0x51f   :  { %392 = vrot.lane.b32.xlu1 %v390_v60, %s3336_s18 }
 0x591   :  { %v393_v63 = vpop.permute.xlu1 %392 }
 0x592   :  { %396 = vst.msk [vmem:[#allocation3 + $0x8] sm:$0xff] %vm194_vm5, %v393_v63  ;;  %2885 = vmatmul.mubr.msk.f32.vlgmr.msra.gmra.mrb[4].mxu0 %vm194_vm5, %v393_v63 }
 0x593   :  { %3141 = vmatpush3.bf16.msra.mxu0 %v3388_v6  ;;  %2906 = vmatprep.mubr.msk.f32.mxu0 %vm3333_vm1, %v3334_v14 }
 0x594   :  { %3142 = vmatprep.subr.bf16.mxu0 %v3332_v8 }
 0x597   :  { %3144 = vmatpush3.bf16.msra.mxu0 %v3409_v13 }
 0x598   :  { %3151 = vmatprep.subr.bf16.mxu0 %v3332_v8 }
 0x665   :  { %v467_v2 = vpop.f32.mrb[4].mxu0 }
 0x666   :  { %v471_v3 = vadd.f32 %v467_v2, %v152_v1  ;;  %v2886_v4 = vpop.f32.mrb[5].mxu0  ;;  %v167_v1 = vadd.f32 %v3431_v15, %v47_v0  ;;  %v25_v15 = vld [vmem:[%s3892_s2 + $0x28] sm:$0xff] }
 0x668   :  { %3258 = vtanh.f32 %v471_v3 }
 0x672   :  { %v3259_v5 = vpop.eup %3258 }
 0x673   :  { %v473_v7 = vmul.f32 0.5, %v3259_v5 }
 0x675   :  { %v474_v9 = vadd.f32 0.5, %v473_v7 }
 0x677   :  { %v475_v10 = vsel %vm3447_vm4, %v3259_v5, %v474_v9 }
 0x678   :  { %478 = vrot.lane.b32.xlu0 %v475_v10, %s3335_s17  ;;  %v476_v17 = vmul.f32 %v475_v10, %v384_v55 }
 0x6ea   :  { %v479_v11 = vpop.permute.xlu0 %478 }
 0x6eb   :  { %v481_v12 = vmul.f32 %v479_v11, %v475_v10 }
 0x6ed   :  { %483 = vrot.lane.b32.xlu1 %v481_v12, %s3336_s18 }
 0x75f   :  { %v484_v18 = vpop.permute.xlu1 %483 }
 0x760   :  { %v486_v20 = vadd.f32 %v484_v18, %v476_v17  ;;  %v26_v18 = vld [vmem:[%s3892_s2 + $0x30] sm:$0xff] }
 0x762   :  { %3260 = vtanh.f32 %v486_v20 }
 0x76c   :  { %v3261_v22 = vpop.eup %3260 }
 0x76d   :  { %489 = vrot.lane.b32.xlu0 %v3261_v22, %s3335_s17 }
 0x7df   :  { %v490_v23 = vpop.permute.xlu0 %489 }
 0x7e0   :  { %v492_v24 = vmul.f32 %v490_v23, %v475_v10 }
 0x7e2   :  { %494 = vrot.lane.b32.xlu1 %v492_v24, %s3336_s18 }
 0x854   :  { %v495_v25 = vpop.permute.xlu1 %494 }
 0x855   :  { %498 = vst.msk [vmem:[#allocation3 + $0x10] sm:$0xff] %vm194_vm5, %v495_v25  ;;  %2896 = vmatmul.mubr.msk.f32.vlgmr.msra.gmra.mrb[8].mxu1 %vm194_vm5, %v495_v25  ;;  %v27_v25 = vld [vmem:[%s3892_s2 + $0x38] sm:$0xff] }
 0x856   :  { %3147 = vmatpush3.bf16.msra.mxu1 %v3388_v6  ;;  %2917 = vmatprep.mubr.msk.f32.mxu1 %vm3333_vm1, %v3334_v14 }
 0x857   :  { %3148 = vmatprep.subr.bf16.mxu1 %v3332_v8 }
 0x85a   :  { %3150 = vmatpush3.bf16.msra.mxu1 %v3409_v13 }
 0x85b   :  { %3157 = vmatprep.subr.bf16.mxu1 %v3332_v8 }
 0x928   :  { %v569_v31 = vpop.f32.mrb[8].mxu1 }
 0x929   :  { %v573_v32 = vadd.f32 %v569_v31, %v157_v29  ;;  %v2897_v33 = vpop.f32.mrb[9].mxu1  ;;  %v3167_v29 = vpack.c.bf16 %v28_v28, %v27_v25 }
 0x92a   :  { %v1010_v33 = vld [vmem:[#allocation3 + $0x8] sm:$0xff] }
 0x92b   :  { %3262 = vtanh.f32 %v573_v32  ;;  %v1009_v32 = vld [vmem:[#allocation3] sm:$0xff] }
 0x935   :  { %v3263_v34 = vpop.eup %3262 }
 0x936   :  { %v575_v35 = vmul.f32 0.5, %v3263_v34 }
 0x938   :  { %v576_v36 = vadd.f32 0.5, %v575_v35 }
 0x93a   :  { %v577_v37 = vsel %vm3447_vm4, %v3263_v34, %v576_v36  ;;  %v1011_v34 = vld [vmem:[#allocation3 + $0x10] sm:$0xff] }
 0x93b   :  { %580 = vrot.lane.b32.xlu0 %v577_v37, %s3335_s17  ;;  %v578_v40 = vmul.f32 %v577_v37, %v486_v20  ;;  %v3163_v20 = vpack.c.bf16 %v26_v18, %v25_v15 }
 0x9ad   :  { %v581_v38 = vpop.permute.xlu0 %580 }
 0x9ae   :  { %v583_v39 = vmul.f32 %v581_v38, %v577_v37  ;;  %v48_v38 = vld [vmem:[%s3894_s1 + $0x30] sm:$0xff] }
 0x9b0   :  { %585 = vrot.lane.b32.xlu1 %v583_v39, %s3336_s18  ;;  %v172_v39 = vadd.f32 %v3440_v21, %v48_v38 }
 0xa22   :  { %v586_v41 = vpop.permute.xlu1 %585 }
 0xa23   :  { %v588_v42 = vadd.f32 %v586_v41, %v578_v40 }
 0xa25   :  { %3264 = vtanh.f32 %v588_v42 }
 0xa2f   :  { %v3265_v43 = vpop.eup %3264 }
 0xa30   :  { %591 = vrot.lane.b32.xlu0 %v3265_v43, %s3335_s17 }
 0xaa2   :  { %v592_v44 = vpop.permute.xlu0 %591 }
 0xaa3   :  { %v594_v45 = vmul.f32 %v592_v44, %v577_v37 }
 0xaa5   :  { %596 = vrot.lane.b32.xlu1 %v594_v45, %s3336_s18 }
 0xb17   :  { %v597_v46 = vpop.permute.xlu1 %596 }
 0xb18   :  { %600 = vst.msk [vmem:[#allocation3 + $0x18] sm:$0xff] %vm194_vm5, %v597_v46  ;;  %2907 = vmatmul.mubr.msk.f32.vlgmr.msra.gmra.mrb[6].mxu0 %vm194_vm5, %v597_v46 }
 0xb19   :  { %3153 = vmatpush3.bf16.msra.mxu0 %v3388_v6  ;;  %2928 = vmatprep.mubr.msk.f32.mxu0 %vm3333_vm1, %v3334_v14 }
 0xb1a   :  { %3154 = vmatprep.subr.bf16.mxu0 %v3332_v8 }
 0xb1d   :  { %3156 = vmatpush3.bf16.msra.mxu0 %v3409_v13 }
 0xb1e   :  { %3164 = vmatprep.subr.bf16.mxu0 %v3163_v20 }
 0xb1f   :  { %v1012_v35 = vld [vmem:[#allocation3 + $0x18] sm:$0xff] }
 0xbeb   :  { %v671_v49 = vpop.f32.mrb[6].mxu0 }
 0xbec   :  { %v675_v50 = vadd.f32 %v671_v49, %v162_v48  ;;  %v2908_v51 = vpop.f32.mrb[7].mxu0 }
 0xbee   :  { %3266 = vtanh.f32 %v675_v50 }
 0xbf8   :  { %v3267_v52 = vpop.eup %3266 }
 0xbf9   :  { %v677_v53 = vmul.f32 0.5, %v3267_v52 }
 0xbfb   :  { %v678_v54 = vadd.f32 0.5, %v677_v53 }
 0xbfd   :  { %v679_v55 = vsel %vm3447_vm4, %v3267_v52, %v678_v54 }
 0xbfe   :  { %682 = vrot.lane.b32.xlu0 %v679_v55, %s3335_s17  ;;  %v680_v58 = vmul.f32 %v679_v55, %v588_v42 }
 0xc70   :  { %v683_v56 = vpop.permute.xlu0 %682 }
 0xc71   :  { %v685_v57 = vmul.f32 %v683_v56, %v679_v55 }
 0xc73   :  { %687 = vrot.lane.b32.xlu1 %v685_v57, %s3336_s18 }
 0xce5   :  { %v688_v59 = vpop.permute.xlu1 %687 }
 0xce6   :  { %v690_v60 = vadd.f32 %v688_v59, %v680_v58  ;;  %v29_v58 = vld [vmem:[%s3892_s2 + $0x48] sm:$0xff]  ;;  %v30_v59 = vld [vmem:[%s3892_s2 + $0x50] sm:$0xff] }
 0xce8   :  { %3268 = vtanh.f32 %v690_v60 }
 0xcf2   :  { %v3269_v16 = vpop.eup %3268 }
 0xcf3   :  { %693 = vrot.lane.b32.xlu0 %v3269_v16, %s3335_s17  ;;  %v31_v16 = vld [vmem:[%s3892_s2 + $0x58] sm:$0xff] }
 0xd65   :  { %v694_v61 = vpop.permute.xlu0 %693 }
 0xd66   :  { %v696_v62 = vmul.f32 %v694_v61, %v679_v55  ;;  %v32_v61 = vld [vmem:[%s3892_s2 + $0x60] sm:$0xff] }
 0xd68   :  { %698 = vrot.lane.b32.xlu1 %v696_v62, %s3336_s18  ;;  %v3612_v62 = vpack.c.bf16 %v32_v61, %v31_v16 }
 0xdda   :  { %v699_v63 = vpop.permute.xlu1 %698 }
 0xddb   :  { %702 = vst.msk [vmem:[#allocation3 + $0x20] sm:$0xff] %vm194_vm5, %v699_v63  ;;  %2918 = vmatmul.mubr.msk.f32.vlgmr.msra.gmra.mrb[10].mxu1 %vm194_vm5, %v699_v63 }
 0xddc   :  { %3159 = vmatpush3.bf16.msra.mxu1 %v3388_v6  ;;  %2939 = vmatprep.mubr.msk.f32.mxu1 %vm3333_vm1, %v3334_v14 }
 0xddd   :  { %3160 = vmatprep.subr.bf16.mxu1 %v3332_v8 }
 0xde0   :  { %3162 = vmatpush3.bf16.msra.mxu1 %v3409_v13 }
 0xde1   :  { %3171 = vmatprep.subr.bf16.mxu1 %v3332_v8 }
 0xde2   :  { %v1013_v36 = vld [vmem:[#allocation3 + $0x20] sm:$0xff] }
 0xeae   :  { %v773_v2 = vpop.f32.mrb[10].mxu1 }
 0xeaf   :  { %v777_v3 = vadd.f32 %v773_v2, %v167_v1  ;;  %v2919_v4 = vpop.f32.mrb[11].mxu1 }
 0xeb1   :  { %3270 = vtanh.f32 %v777_v3  ;;  %v49_v3 = vld [vmem:[%s3894_s1 + $0x38] sm:$0xff] }
 0xeb2   :  { %v177_v4 = vadd.f32 %v3438_v19, %v49_v3 }
 0xebb   :  { %v3271_v6 = vpop.eup %3270 }
 0xebc   :  { %v779_v5 = vmul.f32 0.5, %v3271_v6 }
 0xebe   :  { %v780_v7 = vadd.f32 0.5, %v779_v5 }
 0xec0   :  { %v781_v9 = vsel %vm3447_vm4, %v3271_v6, %v780_v7 }
 0xec1   :  { %784 = vrot.lane.b32.xlu0 %v781_v9, %s3335_s17  ;;  %v782_v11 = vmul.f32 %v781_v9, %v690_v60  ;;  %v3602_v60 = vpack.c.bf16 %v30_v59, %v29_v58 }
 0xf33   :  { %v785_v13 = vpop.permute.xlu0 %784 }
 0xf34   :  { %v787_v10 = vmul.f32 %v785_v13, %v781_v9 }
 0xf36   :  { %789 = vrot.lane.b32.xlu1 %v787_v10, %s3336_s18 }
 0xfa8   :  { %v790_v12 = vpop.permute.xlu1 %789 }
 0xfa9   :  { %v792_v17 = vadd.f32 %v790_v12, %v782_v11 }
 0xfab   :  { %3272 = vtanh.f32 %v792_v17 }
 0xfb5   :  { %v3273_v22 = vpop.eup %3272 }
 0xfb6   :  { %795 = vrot.lane.b32.xlu0 %v3273_v22, %s3335_s17 }
0x1028   :  { %v796_v23 = vpop.permute.xlu0 %795 }
0x1029   :  { %v798_v24 = vmul.f32 %v796_v23, %v781_v9  ;;  %v3640_v9 = vld [vmem:[%s3892_s2 + $0x68] ss:$0 sm:$0xff] }
0x102b   :  { %800 = vrot.lane.b32.xlu1 %v798_v24, %s3336_s18 }
0x109d   :  { %v801_v31 = vpop.permute.xlu1 %800 }
0x109e   :  { %804 = vst.msk [vmem:[#allocation3 + $0x28] sm:$0xff] %vm194_vm5, %v801_v31  ;;  %2929 = vmatmul.mubr.msk.f32.vlgmr.msra.gmra.mrb[8].mxu0 %vm194_vm5, %v801_v31 }
0x109f   :  { %3166 = vmatpush3.bf16.msra.mxu0 %v3163_v20  ;;  %2950 = vmatprep.mubr.msk.f32.mxu0 %vm194_vm5, %v1009_v32 }
0x10a0   :  { %3168 = vmatprep.subr.bf16.mxu0 %v3167_v29 }
0x10a3   :  { %3170 = vmatpush3.bf16.msra.mxu0 %v3167_v29 }
0x10a4   :  { %3183 = vmatprep.subr.bf16.mxu0 %v3332_v8 }
0x10a5   :  { %v1014_v37 = vld [vmem:[#allocation3 + $0x28] sm:$0xff] }
0x10a6   :  { %2951 = vmatmul.mubr.msk.f32.vlgmr.msra.gmra.mrb[10].mxu0 %vm194_vm5, %v1010_v33 }
0x10a7   :  { %2953 = vmatprep.mubr.msk.f32.mxu0 %vm194_vm5, %v1011_v34  ;;  %3185 = vmatpush3.bf16.msra.mxu0 %v3602_v60 }
0x10a8   :  { %3186 = vmatprep.subr.bf16.mxu0 %v3332_v8 }
0x10aa   :  { %2954 = vmatmul.mubr.msk.f32.gmra.mrb[12].mxu0 %vm194_vm5, %v1012_v35 }
0x10ab   :  { %2956 = vmatprep.mubr.msk.f32.mxu0 %vm194_vm5, %v1013_v36  ;;  %3188 = vmatpush3.bf16.msra.mxu0 %v3612_v62 }
0x10ac   :  { %3195 = vmatprep.subr.bf16.mxu0 %v3332_v8 }
0x10ae   :  { %2957 = vmatmul.mubr.msk.f32.gmra.mrb[14].mxu0 %vm194_vm5, %v1014_v37 }
0x1171   :  { %v875_v40 = vpop.f32.mrb[8].mxu0 }
0x1172   :  { %v879_v41 = vadd.f32 %v875_v40, %v172_v39  ;;  %v2930_v42 = vpop.f32.mrb[9].mxu0 }
0x1174   :  { %3274 = vtanh.f32 %v879_v41 }
0x1179   :  { %v3578_v43 = vpop.f32.mrb[10].mxu0 }
0x117a   :  { %v1111_v44 = vpop.f32.mrb[11].mxu0 }
0x117b   :  { %v1112_v13 = vadd.f32 %v3640_v9, %v1111_v44 }
0x117d   :  { %v3580_v45 = vpop.f32.mrb[12].mxu0 }
0x117e   :  { %v3275_v46 = vpop.eup %3274  ;;  %v3582_v47 = vpop.f32.mrb[13].mxu0 }
0x117f   :  { %v881_v48 = vmul.f32 0.5, %v3275_v46 }
0x1181   :  { %v3584_v49 = vpop.f32.mrb[14].mxu0  ;;  %v882_v50 = vadd.f32 0.5, %v881_v48  ;;  %v1117_v48 = vadd.f32 %v3578_v43, %v3640_v9 }
0x1182   :  { %v3586_v51 = vpop.f32.mrb[15].mxu0 }
0x1183   :  { %v883_v21 = vsel %vm3447_vm4, %v3275_v46, %v882_v50 }
0x1184   :  { %886 = vrot.lane.b32.xlu0 %v883_v21, %s3335_s17  ;;  %v884_v54 = vmul.f32 %v883_v21, %v792_v17 }
0x11f6   :  { %v887_v52 = vpop.permute.xlu0 %886 }
0x11f7   :  { %v889_v53 = vmul.f32 %v887_v52, %v883_v21 }
0x11f9   :  { %891 = vrot.lane.b32.xlu1 %v889_v53, %s3336_s18 }
0x126b   :  { %v892_v55 = vpop.permute.xlu1 %891 }
0x126c   :  { %v3592_v56 = vadd.f32 %v892_v55, %v884_v54 }
0x126e   :  { %3276 = vtanh.f32 %v3592_v56 }
0x1278   :  { %v3277_v57 = vpop.eup %3276 }
0x1279   :  { %897 = vrot.lane.b32.xlu0 %v3277_v57, %s3335_s17 }
0x12eb   :  { %v898_v63 = vpop.permute.xlu0 %897 }
0x12ec   :  { %v900_v0 = vmul.f32 %v898_v63, %v883_v21 }
0x12ee   :  { %902 = vrot.lane.b32.xlu1 %v900_v0, %s3336_s18 }
0x1360   :  { %v903_v1 = vpop.permute.xlu1 %902 }
0x1361   :  { %906 = vst.msk [vmem:[#allocation3 + $0x30] sm:$0xff] %vm194_vm5, %v903_v1  ;;  %2940 = vmatmul.mubr.msk.f32.vlgmr.msra.gmra.mrb[12].mxu1 %vm194_vm5, %v903_v1 }
0x1362   :  { %3173 = vmatpush3.bf16.msra.mxu1 %v3602_v60  ;;  %2970 = vmatprep.mubr.msk.f32.mxu1 %vm3333_vm1, %v3334_v14 }
0x1363   :  { %3174 = vmatprep.subr.bf16.mxu1 %v3332_v8 }
0x1366   :  { %3176 = vmatpush3.bf16.msra.mxu1 %v3612_v62 }
0x1367   :  { %3177 = vmatprep.subr.bf16.mxu1 %v3332_v8 }
0x1368   :  { %v1015_v2 = vld [vmem:[#allocation3 + $0x30] sm:$0xff] }
0x1369   :  { %2971 = vmatmul.mubr.f32.vlgmr.msra.gmra.mrb[14].mxu1 %v3334_v14  ;;  %2959 = vmatprep.mubr.msk.f32.mxu0 %vm194_vm5, %v1015_v2 }
0x136a   :  { %3179 = vmatpush3.bf16.msra.mxu1 %v3602_v60  ;;  %2981 = vmatprep.mubr.msk.f32.mxu1 %vm3333_vm1, %v3334_v14 }
0x136b   :  { %3180 = vmatprep.subr.bf16.mxu1 %v3332_v8 }
0x136e   :  { %3182 = vmatpush3.bf16.msra.mxu1 %v3612_v62 }
0x136f   :  { %3189 = vmatprep.subr.bf16.mxu1 %v3332_v8 }
0x1434   :  { %v977_v6 = vpop.f32.mrb[12].mxu1 }
0x1435   :  { %v981_v5 = vadd.f32 %v977_v6, %v177_v4  ;;  %v2941_v7 = vpop.f32.mrb[13].mxu1 }
0x143c   :  { %v1225_v10 = vpop.f32.mrb[14].mxu1 }
0x143d   :  { %v1229_v11 = vadd.f32 %v1225_v10, %v1112_v13  ;;  %v2972_v12 = vpop.f32.mrb[15].mxu1 }
0x143f   :  { %3278 = vtanh.f32 %v1229_v11 }
0x1440   :  { %3280 = vtanh.f32 %v981_v5  ;;  %v1122_v5 = vadd.f32 %v3640_v9, %v3582_v47 }
0x1449   :  { %v3279_v17 = vpop.eup %3278 }
0x144a   :  { %v1231_v15 = vmul.f32 0.5, %v3279_v17  ;;  %v3281_v28 = vpop.eup %3280 }
0x144b   :  { %v983_v29 = vmul.f32 0.5, %v3281_v28 }
0x144c   :  { %v1232_v18 = vadd.f32 0.5, %v1231_v15 }
0x144d   :  { %v984_v32 = vadd.f32 0.5, %v983_v29  ;;  %v1127_v29 = vadd.f32 %v3580_v45, %v3640_v9 }
0x144e   :  { %v1233_v19 = vsel %vm3447_vm4, %v3279_v17, %v1232_v18 }
0x144f   :  { %1236 = vrot.lane.b32.xlu0 %v1233_v19, %s3335_s17  ;;  %v1234_v23 = vmul.f32 0.0, %v1233_v19  ;;  %v985_v33 = vsel %vm3447_vm4, %v3281_v28, %v984_v32 }
0x1450   :  { %v986_v39 = vmul.f32 %v985_v33, %v3592_v56 }
0x14c1   :  { %v1237_v20 = vpop.permute.xlu0 %1236 }
0x14c2   :  { %v1239_v22 = vmul.f32 %v1237_v20, %v1233_v19 }
0x14c4   :  { %1241 = vrot.lane.b32.xlu1 %v1239_v22, %s3336_s18 }
0x1536   :  { %v1242_v24 = vpop.permute.xlu1 %1241 }
0x1537   :  { %v1244_v25 = vadd.f32 %v1242_v24, %v1234_v23 }
0x1539   :  { %3282 = vtanh.f32 %v1244_v25 }
0x1543   :  { %v3283_v31 = vpop.eup %3282 }
0x1544   :  { %1247 = vrot.lane.b32.xlu0 %v3283_v31, %s3335_s17 }
0x1548   :  { %988 = vrot.lane.b32.xlu0 %v985_v33, %s3335_s17 }
0x15b6   :  { %v1248_v34 = vpop.permute.xlu0 %1247 }
0x15b7   :  { %v1250_v35 = vmul.f32 %v1248_v34, %v1233_v19 }
0x15b9   :  { %1252 = vrot.lane.b32.xlu1 %v1250_v35, %s3336_s18 }
0x15ba   :  { %v989_v36 = vpop.permute.xlu0 %988 }
0x15bb   :  { %v991_v37 = vmul.f32 %v989_v36, %v985_v33 }
0x15bd   :  { %993 = vrot.lane.b32.xlu0 %v991_v37, %s3336_s18 }
0x162b   :  { %v1253_v38 = vpop.permute.xlu1 %1252 }
0x162c   :  { %1255 = vst.msk [vmem:[#allocation3] sm:$0xff] %vm194_vm5, %v1253_v38  ;;  %2982 = vmatmul.mubr.msk.f32.vlgmr.msra.gmra.mrb[16].mxu1 %vm194_vm5, %v1253_v38 }
0x162d   :  { %3191 = vmatpush3.bf16.msra.mxu1 %v3602_v60  ;;  %3003 = vmatprep.mubr.msk.f32.mxu1 %vm3333_vm1, %v3334_v14 }
0x162e   :  { %3192 = vmatprep.subr.bf16.mxu1 %v3332_v8 }
0x162f   :  { %v994_v40 = vpop.permute.xlu0 %993 }
0x1630   :  { %v996_v41 = vadd.f32 %v994_v40, %v986_v39 }
0x1631   :  { %3194 = vmatpush3.bf16.msra.mxu1 %v3612_v62 }
0x1632   :  { %3284 = vtanh.f32 %v996_v41  ;;  %3201 = vmatprep.subr.bf16.mxu1 %v3332_v8 }
0x163c   :  { %v3285_v42 = vpop.eup %3284 }
0x163d   :  { %999 = vrot.lane.b32.xlu0 %v3285_v42, %s3335_s17 }
0x16af   :  { %v1000_v44 = vpop.permute.xlu0 %999 }
0x16b0   :  { %v1002_v46 = vmul.f32 %v1000_v44, %v985_v33 }
0x16b2   :  { %1004 = vrot.lane.b32.xlu0 %v1002_v46, %s3336_s18 }
0x16ff   :  { %v1325_v50 = vpop.f32.mrb[16].mxu1 }
0x1700   :  { %v1329_v21 = vadd.f32 %v1325_v50, %v1117_v48  ;;  %v2983_v52 = vpop.f32.mrb[17].mxu1  ;;  %v1132_v50 = vadd.f32 %v3640_v9, %v3586_v51 }
0x1702   :  { %3286 = vtanh.f32 %v1329_v21 }
0x170c   :  { %v3287_v53 = vpop.eup %3286 }
0x170d   :  { %v1331_v54 = vmul.f32 0.5, %v3287_v53 }
0x170f   :  { %v1332_v55 = vadd.f32 0.5, %v1331_v54 }
0x1711   :  { %v1333_v56 = vsel %vm3447_vm4, %v3287_v53, %v1332_v55 }
0x1712   :  { %1336 = vrot.lane.b32.xlu1 %v1333_v56, %s3335_s17  ;;  %v1334_v16 = vmul.f32 %v1333_v56, %v1244_v25 }
0x1724   :  { %v1005_v57 = vpop.permute.xlu0 %1004 }
0x1725   :  { %1008 = vst.msk [vmem:[#allocation3 + $0x38] sm:$0xff] %vm194_vm5, %v1005_v57 }
0x172c   :  { %v1016_v58 = vld [vmem:[#allocation3 + $0x38] sm:$0xff] }
0x172d   :  { %2960 = vmatmul.mubr.msk.f32.gmra.mrb[16].mxu0 %vm194_vm5, %v1016_v58 }
0x172e   :  { %2992 = vmatprep.mubr.msk.f32.mxu0 %vm3333_vm1, %v3334_v14 }
0x1784   :  { %v1337_v43 = vpop.permute.xlu1 %1336 }
0x1785   :  { %v1339_v59 = vmul.f32 %v1337_v43, %v1333_v56 }
0x1787   :  { %1341 = vrot.lane.b32.xlu1 %v1339_v59, %s3336_s18 }
0x17f9   :  { %v1342_v61 = vpop.permute.xlu1 %1341 }
0x17fa   :  { %v1344_v63 = vadd.f32 %v1342_v61, %v1334_v16 }
0x17fc   :  { %3288 = vtanh.f32 %v1344_v63 }
0x1800   :  { %v3674_v0 = vpop.f32.mrb[16].mxu0 }
0x1801   :  { %v3676_v1 = vpop.f32.mrb[17].mxu0 }
0x1806   :  { %v3289_v2 = vpop.eup %3288 }
0x1807   :  { %1347 = vrot.lane.b32.xlu1 %v3289_v2, %s3335_s17 }
0x1879   :  { %v1348_v3 = vpop.permute.xlu1 %1347 }
0x187a   :  { %v1350_v4 = vmul.f32 %v1348_v3, %v1333_v56 }
0x187c   :  { %1352 = vrot.lane.b32.xlu1 %v1350_v4, %s3336_s18  ;;  %v1137_v4 = vadd.f32 %v3584_v49, %v3640_v9  ;;  %v1956_v49 = vld [vmem:[%s3895_s3] sm:$0xff] }
0x18ee   :  { %v1353_v6 = vpop.permute.xlu1 %1352 }
0x18ef   :  { %1355 = vst.msk [vmem:[#allocation3 + $0x8] sm:$0xff] %vm194_vm5, %v1353_v6  ;;  %2993 = vmatmul.mubr.msk.f32.vlgmr.msra.gmra.mrb[18].mxu0 %vm194_vm5, %v1353_v6 }
0x18f0   :  { %3197 = vmatpush3.bf16.msra.mxu0 %v3602_v60  ;;  %3014 = vmatprep.mubr.msk.f32.mxu0 %vm3333_vm1, %v3334_v14 }
0x18f1   :  { %3198 = vmatprep.subr.bf16.mxu0 %v3332_v8 }
0x18f4   :  { %3200 = vmatpush3.bf16.msra.mxu0 %v3612_v62 }
0x18f5   :  { %3207 = vmatprep.subr.bf16.mxu0 %v3332_v8 }
0x19c2   :  { %v1425_v7 = vpop.f32.mrb[18].mxu0 }
0x19c3   :  { %v1429_v13 = vadd.f32 %v1425_v7, %v1122_v5  ;;  %v2994_v10 = vpop.f32.mrb[19].mxu0 }
0x19c5   :  { %3290 = vtanh.f32 %v1429_v13 }
0x19cf   :  { %v3291_v11 = vpop.eup %3290 }
0x19d0   :  { %v1431_v12 = vmul.f32 0.5, %v3291_v11 }
0x19d2   :  { %v1432_v17 = vadd.f32 0.5, %v1431_v12 }
0x19d4   :  { %v1433_v15 = vsel %vm3447_vm4, %v3291_v11, %v1432_v17 }
0x19d5   :  { %1436 = vrot.lane.b32.xlu0 %v1433_v15, %s3335_s17  ;;  %v1434_v20 = vmul.f32 %v1433_v15, %v1344_v63 }
0x1a47   :  { %v1437_v18 = vpop.permute.xlu0 %1436 }
0x1a48   :  { %v1439_v19 = vmul.f32 %v1437_v18, %v1433_v15 }
0x1a4a   :  { %1441 = vrot.lane.b32.xlu1 %v1439_v19, %s3336_s18  ;;  %v1957_v19 = vld [vmem:[%s3895_s3 + $0x8] sm:$0xff] }
0x1abc   :  { %v1442_v22 = vpop.permute.xlu1 %1441 }
0x1abd   :  { %v1444_v23 = vadd.f32 %v1442_v22, %v1434_v20  ;;  %v3219_v20 = vpack.c.bf16 %v1957_v19, %v1956_v49 }
0x1abf   :  { %3292 = vtanh.f32 %v1444_v23 }
0x1ac9   :  { %v3293_v47 = vpop.eup %3292 }
0x1aca   :  { %1447 = vrot.lane.b32.xlu0 %v3293_v47, %s3335_s17 }
0x1b3c   :  { %v1448_v24 = vpop.permute.xlu0 %1447 }
0x1b3d   :  { %v1450_v25 = vmul.f32 %v1448_v24, %v1433_v15  ;;  %v1958_v24 = vld [vmem:[%s3895_s3 + $0x10] sm:$0xff] }
0x1b3f   :  { %1452 = vrot.lane.b32.xlu1 %v1450_v25, %s3336_s18  ;;  %v1959_v25 = vld [vmem:[%s3895_s3 + $0x18] sm:$0xff] }
0x1bb1   :  { %v1453_v28 = vpop.permute.xlu1 %1452 }
0x1bb2   :  { %1455 = vst.msk [vmem:[#allocation3 + $0x10] sm:$0xff] %vm194_vm5, %v1453_v28  ;;  %3004 = vmatmul.mubr.msk.f32.vlgmr.msra.gmra.mrb[18].mxu1 %vm194_vm5, %v1453_v28  ;;  %v3223_v28 = vpack.c.bf16 %v1959_v25, %v1958_v24  ;;  %v2113_v24 = vadd.s32 1, %v3443_v27 }
0x1bb3   :  { %3203 = vmatpush3.bf16.msra.mxu1 %v3602_v60  ;;  %3025 = vmatprep.mubr.msk.f32.mxu1 %vm3333_vm1, %v3334_v14 }
0x1bb4   :  { %3204 = vmatprep.subr.bf16.mxu1 %v3332_v8 }
0x1bb7   :  { %3206 = vmatpush3.bf16.msra.mxu1 %v3612_v62 }
0x1bb8   :  { %3213 = vmatprep.subr.bf16.mxu1 %v3332_v8 }
0x1c85   :  { %v1525_v31 = vpop.f32.mrb[18].mxu1 }
0x1c86   :  { %v1529_v32 = vadd.f32 %v1525_v31, %v1127_v29  ;;  %v3005_v33 = vpop.f32.mrb[19].mxu1  ;;  %v1961_v31 = vld [vmem:[#allocation3] sm:$0xff] }
0x1c87   :  { %v1963_v33 = vld [vmem:[#allocation3 + $0x10] sm:$0xff] }
0x1c88   :  { %3294 = vtanh.f32 %v1529_v32  ;;  %v1962_v32 = vld [vmem:[#allocation3 + $0x8] sm:$0xff] }
0x1c92   :  { %v3295_v34 = vpop.eup %3294 }
0x1c93   :  { %v1531_v35 = vmul.f32 0.5, %v3295_v34 }
0x1c95   :  { %v1532_v36 = vadd.f32 0.5, %v1531_v35 }
0x1c97   :  { %v1533_v37 = vsel %vm3447_vm4, %v3295_v34, %v1532_v36 }
0x1c98   :  { %1536 = vrot.lane.b32.xlu0 %v1533_v37, %s3335_s17  ;;  %v1534_v40 = vmul.f32 %v1533_v37, %v1444_v23 }
0x1d0a   :  { %v1537_v38 = vpop.permute.xlu0 %1536 }
0x1d0b   :  { %v1539_v39 = vmul.f32 %v1537_v38, %v1533_v37 }
0x1d0d   :  { %1541 = vrot.lane.b32.xlu1 %v1539_v39, %s3336_s18 }
0x1d7f   :  { %v1542_v41 = vpop.permute.xlu1 %1541 }
0x1d80   :  { %v1544_v42 = vadd.f32 %v1542_v41, %v1534_v40 }
0x1d82   :  { %3296 = vtanh.f32 %v1544_v42 }
0x1d8c   :  { %v3297_v45 = vpop.eup %3296 }
0x1d8d   :  { %1547 = vrot.lane.b32.xlu0 %v3297_v45, %s3335_s17 }
0x1dff   :  { %v1548_v44 = vpop.permute.xlu0 %1547 }
0x1e00   :  { %v1550_v46 = vmul.f32 %v1548_v44, %v1533_v37  ;;  %v1142_v37 = vadd.f32 %v3640_v9, %v3676_v1 }
0x1e02   :  { %1552 = vrot.lane.b32.xlu1 %v1550_v46, %s3336_s18 }
0x1e74   :  { %v1553_v48 = vpop.permute.xlu1 %1552 }
0x1e75   :  { %1555 = vst.msk [vmem:[#allocation3 + $0x18] sm:$0xff] %vm194_vm5, %v1553_v48  ;;  %3015 = vmatmul.mubr.msk.f32.vlgmr.msra.gmra.mrb[20].mxu0 %vm194_vm5, %v1553_v48 }
0x1e76   :  { %3209 = vmatpush3.bf16.msra.mxu0 %v3602_v60  ;;  %3036 = vmatprep.mubr.msk.f32.mxu0 %vm3333_vm1, %v3334_v14 }
0x1e77   :  { %3210 = vmatprep.subr.bf16.mxu0 %v3332_v8 }
0x1e7a   :  { %3212 = vmatpush3.bf16.msra.mxu0 %v3612_v62 }
0x1e7b   :  { %3220 = vmatprep.subr.bf16.mxu0 %v3219_v20 }
0x1e7c   :  { %v1964_v34 = vld [vmem:[#allocation3 + $0x18] sm:$0xff] }
0x1f48   :  { %v1625_v21 = vpop.f32.mrb[20].mxu0 }
0x1f49   :  { %v1629_v52 = vadd.f32 %v1625_v21, %v1132_v50  ;;  %v3016_v53 = vpop.f32.mrb[21].mxu0 }
0x1f4b   :  { %3298 = vtanh.f32 %v1629_v52 }
0x1f55   :  { %v3299_v54 = vpop.eup %3298 }
0x1f56   :  { %v1631_v55 = vmul.f32 0.5, %v3299_v54 }
0x1f58   :  { %v1632_v56 = vadd.f32 0.5, %v1631_v55 }
0x1f5a   :  { %v1633_v57 = vsel %vm3447_vm4, %v3299_v54, %v1632_v56 }
0x1f5b   :  { %1636 = vrot.lane.b32.xlu0 %v1633_v57, %s3335_s17  ;;  %v1634_v59 = vmul.f32 %v1633_v57, %v1544_v42 }
0x1fcd   :  { %v1637_v58 = vpop.permute.xlu0 %1636 }
0x1fce   :  { %v1639_v43 = vmul.f32 %v1637_v58, %v1633_v57 }
0x1fd0   :  { %1641 = vrot.lane.b32.xlu1 %v1639_v43, %s3336_s18 }
0x2042   :  { %v1642_v16 = vpop.permute.xlu1 %1641 }
0x2043   :  { %v1644_v61 = vadd.f32 %v1642_v16, %v1634_v59 }
0x2045   :  { %3300 = vtanh.f32 %v1644_v61 }
0x204f   :  { %v3301_v51 = vpop.eup %3300 }
0x2050   :  { %1647 = vrot.lane.b32.xlu0 %v3301_v51, %s3335_s17  ;;  %v1147_v51 = vadd.f32 %v3674_v0, %v3640_v9  ;;  %v2669_v0 = vld [vmem:[%s3895_s3 + $0x20] ss:$0 sm:$0xff] }
0x20c2   :  { %v1648_v63 = vpop.permute.xlu0 %1647 }
0x20c3   :  { %v1650_v2 = vmul.f32 %v1648_v63, %v1633_v57 }
0x20c5   :  { %1652 = vrot.lane.b32.xlu1 %v1650_v2, %s3336_s18 }
0x2137   :  { %v1653_v3 = vpop.permute.xlu1 %1652 }
0x2138   :  { %1655 = vst.msk [vmem:[#allocation3 + $0x20] sm:$0xff] %vm194_vm5, %v1653_v3  ;;  %3026 = vmatmul.mubr.msk.f32.vlgmr.msra.gmra.mrb[20].mxu1 %vm194_vm5, %v1653_v3 }
0x2139   :  { %3215 = vmatpush3.bf16.msra.mxu1 %v3602_v60  ;;  %3047 = vmatprep.mubr.msk.f32.mxu1 %vm3333_vm1, %v3334_v14 }
0x213a   :  { %3216 = vmatprep.subr.bf16.mxu1 %v3332_v8 }
0x213d   :  { %3218 = vmatpush3.bf16.msra.mxu1 %v3612_v62 }
0x213f   :  { %v1965_v35 = vld [vmem:[#allocation3 + $0x20] sm:$0xff] }
0x220b   :  { %v1725_v6 = vpop.f32.mrb[20].mxu1 }
0x220c   :  { %v1729_v5 = vadd.f32 %v1725_v6, %v1137_v4  ;;  %v3027_v7 = vpop.f32.mrb[21].mxu1 }
0x220e   :  { %3302 = vtanh.f32 %v1729_v5 }
0x2218   :  { %v3303_v13 = vpop.eup %3302 }
0x2219   :  { %v1731_v10 = vmul.f32 0.5, %v3303_v13 }
0x221b   :  { %v1732_v11 = vadd.f32 0.5, %v1731_v10 }
0x221d   :  { %v1733_v60 = vsel %vm3447_vm4, %v3303_v13, %v1732_v11 }
0x221e   :  { %1736 = vrot.lane.b32.xlu0 %v1733_v60, %s3335_s17  ;;  %v1734_v62 = vmul.f32 %v1733_v60, %v1644_v61 }
0x2290   :  { %v1737_v12 = vpop.permute.xlu0 %1736 }
0x2291   :  { %v1739_v17 = vmul.f32 %v1737_v12, %v1733_v60 }
0x2293   :  { %1741 = vrot.lane.b32.xlu1 %v1739_v17, %s3336_s18 }
0x2305   :  { %v1742_v15 = vpop.permute.xlu1 %1741 }
0x2306   :  { %v1744_v18 = vadd.f32 %v1742_v15, %v1734_v62 }
0x2308   :  { %3304 = vtanh.f32 %v1744_v18 }
0x2312   :  { %v3305_v22 = vpop.eup %3304 }
0x2313   :  { %1747 = vrot.lane.b32.xlu0 %v3305_v22, %s3335_s17 }
0x2385   :  { %v1748_v23 = vpop.permute.xlu0 %1747 }
0x2386   :  { %v1750_v47 = vmul.f32 %v1748_v23, %v1733_v60 }
0x2388   :  { %1752 = vrot.lane.b32.xlu1 %v1750_v47, %s3336_s18  ;;  %v3802_v47 = vshrl.u32 %v188_v26, 7 }
0x238a   :  { %v2105_v25 = vadd.s32 8, %v3802_v47  ;;  %v2107_v26 = vadd.s32 24, %v3802_v47 }
0x23fa   :  { %v1753_v29 = vpop.permute.xlu1 %1752 }
0x23fb   :  { %1755 = vst.msk [vmem:[#allocation3 + $0x28] sm:$0xff] %vm194_vm5, %v1753_v29  ;;  %3037 = vmatmul.mubr.msk.f32.vlgmr.msra.gmra.mrb[22].mxu0 %vm194_vm5, %v1753_v29  ;;  %v2114_v29 = vmul.u32 8, %v2113_v24 }
0x23fc   :  { %3222 = vmatpush3.bf16.msra.mxu0 %v3219_v20  ;;  %3058 = vmatprep.mubr.msk.f32.mxu0 %vm194_vm5, %v1961_v31  ;;  %v2106_v31 = vadd.s32 16, %v3802_v47 }
0x23fd   :  { %3224 = vmatprep.subr.bf16.mxu0 %v3223_v28  ;;  %vm2115_vm8 = vcmp.lt.s32.totalorder %v3802_v47, %v2114_v29  ;;  %vm2116_vm9 = vcmp.lt.s32.totalorder %v2105_v25, %v2114_v29  ;;  %vm2118_vm0 = vcmp.lt.s32.totalorder %v2107_v26, %v2114_v29 }
0x23fe   :  { %vm2117_vm15 = vcmp.lt.s32.totalorder %v2106_v31, %v2114_v29 }
0x2400   :  { %3226 = vmatpush3.bf16.msra.mxu0 %v3223_v28  ;;  %v2108_v28 = vmul.u32 8, %v3443_v27 }
0x2402   :  { %v1966_v36 = vld [vmem:[#allocation3 + $0x28] sm:$0xff]  ;;  %vm2109_vm6 = vcmp.ge.s32.totalorder %v3802_v47, %v2108_v28  ;;  %vm2110_vm7 = vcmp.ge.s32.totalorder %v2105_v25, %v2108_v28  ;;  %vm2111_vm13 = vcmp.ge.s32.totalorder %v2106_v31, %v2108_v28  ;;  %vm2112_vm14 = vcmp.ge.s32.totalorder %v2107_v26, %v2108_v28 }
0x2403   :  { %3059 = vmatmul.mubr.msk.f32.vlgmr.msra.gmra.mrb[24].mxu0 %vm194_vm5, %v1962_v32  ;;  %vm2119_vm10 = vmand %vm2109_vm6, %vm2115_vm8  ;;  %v3338_v32 = vmov 1.0|1.0   ;;  %vm2303_vm6 = vcmask 31744   ;;  %vm2394_vm8 = vcmask 1043456  }
0x2404   :  { %3061 = vmatprep.mubr.msk.f32.mxu0 %vm194_vm5, %v1963_v33  ;;  %vm2120_vm11 = vmand %vm2110_vm7, %vm2116_vm9 }
0x2405   :  { %vm3227_vm12 = vmpackc.low %vm2120_vm11, %vm2119_vm10  ;;  %vm2632_vm10 = vcmask 7168  }
0x2406   :  { %3228 = vmatprep.subr.msk.bf16.mxu1 %vm3227_vm12, %v3338_v32  ;;  %vm2121_vm2 = vmand %vm2111_vm13, %vm2117_vm15 }
0x2407   :  { %3062 = vmatmul.mubr.msk.f32.gmra.mrb[26].mxu0 %vm194_vm5, %v1964_v34  ;;  %vm2122_vm3 = vmand %vm2112_vm14, %vm2118_vm0 }
0x2408   :  { %3064 = vmatprep.mubr.msk.f32.mxu0 %vm194_vm5, %v1965_v35 }
0x240b   :  { %3065 = vmatmul.mubr.msk.f32.gmra.mrb[28].mxu0 %vm194_vm5, %v1966_v36 }
0x24ce   :  { %v1825_v38 = vpop.f32.mrb[22].mxu0 }
0x24cf   :  { %v1829_v39 = vadd.f32 %v1825_v38, %v1142_v37  ;;  %v3038_v40 = vpop.f32.mrb[23].mxu0 }
0x24d1   :  { %3306 = vtanh.f32 %v1829_v39 }
0x24d6   :  { %v3060_v41 = vpop.f32.mrb[24].mxu0 }
0x24d7   :  { %v2063_v42 = vpop.f32.mrb[25].mxu0  ;;  %v2069_v49 = vadd.f32 %v3060_v41, %v2669_v0 }
0x24d8   :  { %v3783_v17 = vadd.f32 %v2669_v0, %v2063_v42 }
0x24da   :  { %v3063_v45 = vpop.f32.mrb[26].mxu0 }
0x24db   :  { %v3307_v44 = vpop.eup %3306  ;;  %v2073_v46 = vpop.f32.mrb[27].mxu0  ;;  %v2079_v19 = vadd.f32 %v3063_v45, %v2669_v0 }
0x24dc   :  { %v1831_v48 = vmul.f32 0.5, %v3307_v44  ;;  %v3787_v30 = vadd.f32 %v2669_v0, %v2073_v46 }
0x24de   :  { %v3066_v50 = vpop.f32.mrb[28].mxu0  ;;  %v1832_v21 = vadd.f32 0.5, %v1831_v48 }
0x24df   :  { %v2083_v52 = vpop.f32.mrb[29].mxu0  ;;  %v2089_v20 = vadd.f32 %v3066_v50, %v2669_v0 }
0x24e0   :  { %v1833_v53 = vsel %vm3447_vm4, %v3307_v44, %v1832_v21  ;;  %v3791_v62 = vadd.f32 %v2669_v0, %v2083_v52 }
0x24e1   :  { %1836 = vrot.lane.b32.xlu0 %v1833_v53, %s3335_s17  ;;  %v1834_v55 = vmul.f32 %v1833_v53, %v1744_v18 }
0x2553   :  { %v1837_v54 = vpop.permute.xlu0 %1836 }
0x2554   :  { %v1839_v1 = vmul.f32 %v1837_v54, %v1833_v53 }
0x2556   :  { %1841 = vrot.lane.b32.xlu1 %v1839_v1, %s3336_s18 }
0x25c8   :  { %v1842_v56 = vpop.permute.xlu1 %1841 }
0x25c9   :  { %v1844_v57 = vadd.f32 %v1842_v56, %v1834_v55 }
0x25cb   :  { %3308 = vtanh.f32 %v1844_v57 }
0x25d5   :  { %v3309_v58 = vpop.eup %3308 }
0x25d6   :  { %1847 = vrot.lane.b32.xlu0 %v3309_v58, %s3335_s17 }
0x2648   :  { %v1848_v43 = vpop.permute.xlu0 %1847 }
0x2649   :  { %v1850_v59 = vmul.f32 %v1848_v43, %v1833_v53 }
0x264b   :  { %1852 = vrot.lane.b32.xlu1 %v1850_v59, %s3336_s18 }
0x26bd   :  { %v1853_v16 = vpop.permute.xlu1 %1852 }
0x26be   :  { %1855 = vst.msk [vmem:[#allocation3 + $0x30] sm:$0xff] %vm194_vm5, %v1853_v16  ;;  %3048 = vmatmul.mubr.msk.f32.vlgmr.msra.gmra.mrb[22].mxu1 %vm194_vm5, %v1853_v16 }
0x26bf   :  { %3230 = vmatpush3.bf16.msk.msra.mxu1 %vm3227_vm12, %v3338_v32 }
0x26c5   :  { %v1967_v61 = vld [vmem:[#allocation3 + $0x30] sm:$0xff] }
0x26c6   :  { %3067 = vmatprep.mubr.msk.f32.mxu0 %vm194_vm5, %v1967_v61 }
0x2791   :  { %v1925_v63 = vpop.f32.mrb[22].mxu1 }
0x2792   :  { %v1929_v2 = vadd.f32 %v1925_v63, %v1147_v51  ;;  %v3049_v3 = vpop.f32.mrb[23].mxu1 }
0x2794   :  { %3310 = vtanh.f32 %v1929_v2 }
0x279e   :  { %v3311_v4 = vpop.eup %3310 }
0x279f   :  { %v1931_v6 = vmul.f32 0.5, %v3311_v4 }
0x27a1   :  { %v1932_v5 = vadd.f32 0.5, %v1931_v6 }
0x27a3   :  { %v1933_v7 = vsel %vm3447_vm4, %v3311_v4, %v1932_v5  ;;  %vm3231_vm4 = vmpackc.low %vm2122_vm3, %vm2121_vm2  ;;  %v2127_v5 = vmul.u32 8, %v3802_v47 }
0x27a4   :  { %1936 = vrot.lane.b32.xlu0 %v1933_v7, %s3335_s17  ;;  %v1934_v11 = vmul.f32 %v1933_v7, %v1844_v57  ;;  %3232 = vmatprep.subr.msk.bf16.mxu1 %vm3231_vm4, %v3338_v32 }
0x27a5   :  { %3234 = vmatpush3.bf16.msk.msra.mxu1 %vm3231_vm4, %v3338_v32 }
0x27a6   :  { %3235 = vmatprep.subr.bf16.mxu1 %v3332_v8 }
0x2816   :  { %v1937_v13 = vpop.permute.xlu0 %1936 }
0x2817   :  { %v1939_v10 = vmul.f32 %v1937_v13, %v1933_v7 }
0x2819   :  { %1941 = vrot.lane.b32.xlu1 %v1939_v10, %s3336_s18 }
0x288b   :  { %v1942_v60 = vpop.permute.xlu1 %1941 }
0x288c   :  { %v1944_v12 = vadd.f32 %v1942_v60, %v1934_v11 }
0x288e   :  { %3312 = vtanh.f32 %v1944_v12 }
0x2898   :  { %v3313_v9 = vpop.eup %3312 }
0x2899   :  { %1947 = vrot.lane.b32.xlu0 %v3313_v9, %s3335_s17 }
0x289d   :  { %2142 = vrot.lane.b32.xlu0 %v3783_v17, %s3337_s13 }
0x28a1   :  { %2146 = vrot.lane.b32.xlu0 %v3787_v30, %s3337_s13 }
0x28a5   :  { %2150 = vrot.lane.b32.xlu0 %v3791_v62, %s3337_s13 }
0x290b   :  { %v1948_v15 = vpop.permute.xlu0 %1947 }
0x290c   :  { %v1950_v18 = vmul.f32 %v1948_v15, %v1933_v7  ;;  %v2129_v7 = vadd.s32 1, %v3802_v47 }
0x290e   :  { %1952 = vrot.lane.b32.xlu1 %v1950_v18, %s3336_s18  ;;  %v2130_v13 = vmul.u32 8, %v2129_v7 }
0x290f   :  { %v2143_v33 = vpop.permute.xlu0 %2142 }
0x2910   :  { %vm2131_vm7 = vcmp.lt.s32.totalorder %v3443_v27, %v2130_v13  ;;  %v2550_v13 = vld [vmem:[%s3896_s4] sm:$0xff] }
0x2912   :  { %2144 = vrot.lane.b32.xlu1 %v2069_v49, %s3337_s13 }
0x2913   :  { %v2147_v40 = vpop.permute.xlu0 %2146 }
0x2916   :  { %2148 = vrot.lane.b32.xlu1 %v2079_v19, %s3337_s13 }
0x2917   :  { %v2151_v46 = vpop.permute.xlu0 %2150 }
0x291a   :  { %2152 = vrot.lane.b32.xlu1 %v2089_v20, %s3337_s13 }
0x2980   :  { %v1953_v22 = vpop.permute.xlu1 %1952 }
0x2981   :  { %1955 = vst.msk [vmem:[#allocation3 + $0x38] sm:$0xff] %vm194_vm5, %v1953_v22 }
0x2984   :  { %v2145_v35 = vpop.permute.xlu1 %2144 }
0x2988   :  { %v1968_v23 = vld [vmem:[#allocation3 + $0x38] sm:$0xff]  ;;  %v2149_v45 = vpop.permute.xlu1 %2148 }
0x2989   :  { %3068 = vmatmul.mubr.msk.f32.gmra.mrb[30].mxu0 %vm194_vm5, %v1968_v23 }
0x298c   :  { %v2153_v21 = vpop.permute.xlu1 %2152 }
0x2a5c   :  { %v3069_v34 = vpop.f32.mrb[30].mxu0 }
0x2a5d   :  { %v2099_v36 = vadd.f32 %v3069_v34, %v2669_v0  ;;  %v2093_v37 = vpop.f32.mrb[31].mxu0 }
0x2a5e   :  { %v2094_v38 = vadd.f32 %v2669_v0, %v2093_v37 }
0x2a5f   :  { %v2102_v39 = vmul.f32 0.35355338, %v2099_v36  ;;  %2156 = vrot.lane.b32.xlu1 %v2099_v36, %s3337_s13 }
0x2a60   :  { %2154 = vrot.lane.b32.xlu0 %v2094_v38, %s3337_s13 }
0x2a61   :  { %v2166_v41 = vmul.f32 %v2143_v33, %v2102_v39  ;;  %v2167_v42 = vmul.f32 %v2145_v35, %v2102_v39  ;;  %v2168_v44 = vmul.f32 %v2147_v40, %v2102_v39  ;;  %v2169_v48 = vmul.f32 %v2149_v45, %v2102_v39 }
0x2a62   :  { %v2170_v50 = vmul.f32 %v2151_v46, %v2102_v39  ;;  %v2171_v52 = vmul.f32 %v2153_v21, %v2102_v39 }
0x2a63   :  { %2505 = vrot.lane.b32.xlu1 %v2069_v49, %s3335_s17  ;;  %3078 = vmatprep.mubr.msk.f32.mxu1 %vm194_vm5, %v2166_v41 }
0x2a64   :  { %3079 = vmatmul.mubr.msk.f32.vlgmr.msra.gmra.mrb[24].mxu1 %vm194_vm5, %v2167_v42  ;;  %2503 = vrot.lane.b32.xlu0 %v3783_v17, %s3335_s17 }
0x2a65   :  { %3081 = vmatprep.mubr.msk.f32.mxu1 %vm194_vm5, %v2168_v44 }
0x2a67   :  { %2509 = vrot.lane.b32.xlu1 %v2079_v19, %s3335_s17 }
0x2a68   :  { %3082 = vmatmul.mubr.msk.f32.gmra.mrb[26].mxu1 %vm194_vm5, %v2169_v48  ;;  %2507 = vrot.lane.b32.xlu0 %v3787_v30, %s3335_s17 }
0x2a69   :  { %3084 = vmatprep.mubr.msk.f32.mxu1 %vm194_vm5, %v2170_v50 }
0x2a6b   :  { %2513 = vrot.lane.b32.xlu1 %v2089_v20, %s3335_s17 }
0x2a6c   :  { %3085 = vmatmul.mubr.msk.f32.gmra.mrb[28].mxu1 %vm194_vm5, %v2171_v52  ;;  %2511 = vrot.lane.b32.xlu0 %v3791_v62, %s3335_s17 }
0x2a6f   :  { %2517 = vrot.lane.b32.xlu1 %v2099_v36, %s3335_s17 }
0x2a70   :  { %2515 = vrot.lane.b32.xlu0 %v2094_v38, %s3335_s17 }
0x2ad1   :  { %v2157_v53 = vpop.permute.xlu1 %2156 }
0x2ad2   :  { %v2155_v54 = vpop.permute.xlu0 %2154  ;;  %v2173_v55 = vmul.f32 %v2157_v53, %v2102_v39 }
0x2ad3   :  { %v2172_v1 = vmul.f32 %v2155_v54, %v2102_v39 }
0x2ad5   :  { %3087 = vmatprep.mubr.msk.f32.mxu1 %vm194_vm5, %v2172_v1 }
0x2ad6   :  { %3088 = vmatmul.mubr.msk.f32.gmra.mrb[30].mxu1 %vm194_vm5, %v2173_v55 }
0x2ad7   :  { %3112 = vmatprep.mubr.msk.f32.mxu1 %vm3333_vm1, %v3334_v14  ;;  %vm2128_vm1 = vcmp.ge.s32.totalorder %v3443_v27, %v2127_v5 }
0x2ad8   :  { %vm2132_vm9 = vmand %vm2128_vm1, %vm2131_vm7 }
0x2ad9   :  { %v2133_v10 = vsel %vm2132_vm9, 1.0, %v3334_v14 }
0x2ada   :  { %3090 = vmatprep.subr.msk.mxu0 %vm2394_vm8, %v2133_v10 }
0x2adb   :  { %3091 = vmatpush3.msk.msra.mxu0 %vm2394_vm8, %v2133_v10  ;;  %v2551_v10 = vld [vmem:[%s3896_s4 + $0x8] sm:$0xff] }
0x2b37   :  { %v3080_v56 = vpop.f32.mrb[24].mxu1 }
0x2b38   :  { %v2264_v57 = vpop.f32.mrb[25].mxu1  ;;  %v2305_v16 = vsel %vm2303_vm6, %v3080_v56, -inf }
0x2b39   :  { %v2304_v63 = vsel %vm2303_vm6, %v2264_v57, -inf }
0x2b3b   :  { %v3083_v58 = vpop.f32.mrb[26].mxu1 }
0x2b3c   :  { %v2274_v43 = vpop.f32.mrb[27].mxu1  ;;  %v2307_v60 = vsel %vm2303_vm6, %v3083_v58, -inf }
0x2b3d   :  { %v2306_v0 = vsel %vm2303_vm6, %v2274_v43, -inf }
0x2b3f   :  { %v3086_v59 = vpop.f32.mrb[28].mxu1 }
0x2b40   :  { %v2310_v61 = vsel %vm2303_vm6, %v3086_v59, -inf  ;;  %v2284_v51 = vpop.f32.mrb[29].mxu1 }
0x2b41   :  { %v2311_v2 = vmax.f32 %v2305_v16, %v2310_v61  ;;  %v2308_v3 = vsel %vm2303_vm6, %v2284_v51, -inf }
0x2b42   :  { %v2309_v4 = vmax.f32 %v2304_v63, %v2308_v3 }
0x2b44   :  { %v2316_v6 = vmax.f32 %v2309_v4, %v2311_v2 }
0x2ba9   :  { %v3089_v11 = vpop.f32.mrb[30].mxu1 }
0x2baa   :  { %v2314_v12 = vsel %vm2303_vm6, %v3089_v11, -inf  ;;  %v2294_v9 = vpop.f32.mrb[31].mxu1 }
0x2bab   :  { %v2315_v17 = vmax.f32 %v2307_v60, %v2314_v12  ;;  %v2312_v30 = vsel %vm2303_vm6, %v2294_v9, -inf  ;;  %v2552_v60 = vld [vmem:[%s3896_s4 + $0x10] sm:$0xff]  ;;  %v2553_v12 = vld [vmem:[%s3896_s4 + $0x18] sm:$0xff] }
0x2bac   :  { %v2313_v62 = vmax.f32 %v2306_v0, %v2312_v30  ;;  %v2506_v0 = vpop.permute.xlu1 %2505 }
0x2bae   :  { %v2317_v15 = vmax.f32 %v2313_v62, %v2315_v17  ;;  %v2504_v17 = vpop.permute.xlu0 %2503 }
0x2bb0   :  { %v2318_v27 = vmax.f32 %v2316_v6, %v2317_v15  ;;  %v2510_v30 = vpop.permute.xlu1 %2509 }
0x2bb2   :  { %v2319_v18 = vsub.f32 %v2264_v57, %v2318_v27  ;;  %v2320_v49 = vsub.f32 %v3080_v56, %v2318_v27  ;;  %v2321_v19 = vsub.f32 %v2274_v43, %v2318_v27  ;;  %v2322_v14 = vsub.f32 %v3083_v58, %v2318_v27  ;;  %v2508_v15 = vpop.permute.xlu0 %2507 }
0x2bb3   :  { %v2323_v20 = vsub.f32 %v2284_v51, %v2318_v27  ;;  %v2324_v22 = vsub.f32 %v3086_v59, %v2318_v27  ;;  %v2325_v23 = vsub.f32 %v2294_v9, %v2318_v27  ;;  %v2326_v47 = vsub.f32 %v3089_v11, %v2318_v27 }
0x2bb4   :  { %v2327_v24 = vmul.f32 1.442695, %v2319_v18  ;;  %v2329_v25 = vmul.f32 1.442695, %v2320_v49  ;;  %v2331_v28 = vmul.f32 1.442695, %v2321_v19  ;;  %v3236_v11 = vpack.c.bf16 %v2551_v10, %v2550_v13 }
0x2bb5   :  { %v2333_v29 = vmul.f32 1.442695, %v2322_v14  ;;  %v2335_v31 = vmul.f32 1.442695, %v2323_v20  ;;  %v2337_v26 = vmul.f32 1.442695, %v2324_v22  ;;  %v3239_v9 = vpack.c.bf16 %v2553_v12, %v2552_v60 }
0x2bb6   :  { %3314 = vpow2.f32 %v2327_v24  ;;  %v2339_v32 = vmul.f32 1.442695, %v2325_v23  ;;  %v2341_v33 = vmul.f32 1.442695, %v2326_v47  ;;  %3237 = vmatpush3.bf16.msra.mxu1 %v3236_v11  ;;  %v2514_v23 = vpop.permute.xlu1 %2513 }
0x2bb7   :  { %3316 = vpow2.f32 %v2329_v25  ;;  %3238 = vmatprep.subr.bf16.mxu1 %v3332_v8  ;;  %v2512_v25 = vpop.permute.xlu0 %2511 }
0x2bb8   :  { %3318 = vpow2.f32 %v2331_v28 }
0x2bb9   :  { %3320 = vpow2.f32 %v2333_v29 }
0x2bba   :  { %3322 = vpow2.f32 %v2335_v31  ;;  %3240 = vmatpush3.bf16.msra.mxu1 %v3239_v9 }
0x2bbb   :  { %3324 = vpow2.f32 %v2337_v26 }
0x2bbc   :  { %3326 = vpow2.f32 %v2339_v32 }
0x2bbd   :  { %3328 = vpow2.f32 %v2341_v33 }
0x2bc0   :  { %v3315_v34 = vpop.eup %3314 }
0x2bc1   :  { %v3317_v35 = vpop.eup %3316  ;;  %v2343_v36 = vsel %vm2303_vm6, %v3315_v34, 0.0 }
0x2bc2   :  { %v3319_v37 = vpop.eup %3318  ;;  %v2344_v38 = vsel %vm2303_vm6, %v3317_v35, 0.0 }
0x2bc3   :  { %v3321_v39 = vpop.eup %3320  ;;  %v2345_v40 = vadd.f32 %v2344_v38, %v2343_v36  ;;  %v2346_v41 = vsel %vm2303_vm6, %v3319_v37, 0.0  ;;  %v2518_v36 = vpop.permute.xlu1 %2517 }
0x2bc4   :  { %v3323_v42 = vpop.eup %3322  ;;  %v2348_v44 = vsel %vm2303_vm6, %v3321_v39, 0.0 }
0x2bc5   :  { %v2347_v45 = vadd.f32 %v2346_v41, %v2345_v40  ;;  %v3325_v46 = vpop.eup %3324  ;;  %v2350_v50 = vsel %vm2303_vm6, %v3323_v42, 0.0 }
0x2bc6   :  { %v3327_v21 = vpop.eup %3326  ;;  %v2352_v53 = vsel %vm2303_vm6, %v3325_v46, 0.0 }
0x2bc7   :  { %v2349_v48 = vadd.f32 %v2348_v44, %v2347_v45  ;;  %v3329_v54 = vpop.eup %3328  ;;  %v2354_v55 = vsel %vm2303_vm6, %v3327_v21, 0.0 }
0x2bc8   :  { %v2356_v57 = vsel %vm2303_vm6, %v3329_v54, 0.0 }
0x2bc9   :  { %v2351_v52 = vadd.f32 %v2350_v50, %v2349_v48 }
0x2bcb   :  { %v2353_v1 = vadd.f32 %v2352_v53, %v2351_v52  ;;  %v2699_v53 = vld [vmem:[%s3896_s4 + $0x20] ss:$0 sm:$0xff] }
0x2bcd   :  { %v2355_v56 = vadd.f32 %v2354_v55, %v2353_v1 }
0x2bcf   :  { %v2357_v58 = vadd.f32 %v2356_v57, %v2355_v56 }
0x2bd1   :  { %3330 = vrcp.f32 %v2357_v58 }
0x2bdb   :  { %v3331_v43 = vpop.eup %3330 }
0x2bdc   :  { %v2359_v59 = vmul.f32 %v3331_v43, %v2357_v58 }
0x2bde   :  { %v2360_v16 = vsub.f32 2.0, %v2359_v59 }
0x2be0   :  { %v2361_v61 = vmul.f32 %v3331_v43, %v2360_v16 }
0x2be2   :  { %v2362_v51 = vmul.f32 %v3315_v34, %v2361_v61  ;;  %v2363_v63 = vmul.f32 %v3317_v35, %v2361_v61  ;;  %v2364_v2 = vmul.f32 %v3319_v37, %v2361_v61  ;;  %v2365_v3 = vmul.f32 %v3321_v39, %v2361_v61  ;;  %v2516_v39 = vpop.permute.xlu0 %2515 }
0x2be3   :  { %v2366_v4 = vmul.f32 %v3323_v42, %v2361_v61  ;;  %v2367_v6 = vmul.f32 %v3325_v46, %v2361_v61  ;;  %v2368_v5 = vmul.f32 %v3327_v21, %v2361_v61  ;;  %v2369_v7 = vmul.f32 %v3329_v54, %v2361_v61 }
0x2be4   :  { %3092 = vmatprep.mubr.msk.f32.mxu0 %vm2303_vm6, %v2362_v51 }
0x2be5   :  { %3093 = vmatmul.mubr.msk.f32.vlgmr.msra.gmra.mrb[32].mxu0 %vm2303_vm6, %v2363_v63 }
0x2be6   :  { %3095 = vmatprep.mubr.msk.f32.mxu0 %vm2303_vm6, %v2364_v2 }
0x2be9   :  { %3096 = vmatmul.mubr.msk.f32.gmra.mrb[34].mxu0 %vm2303_vm6, %v2365_v3 }
0x2bea   :  { %3098 = vmatprep.mubr.msk.f32.mxu0 %vm2303_vm6, %v2366_v4 }
0x2bed   :  { %3099 = vmatmul.mubr.msk.f32.gmra.mrb[36].mxu0 %vm2303_vm6, %v2367_v6 }
0x2bee   :  { %3101 = vmatprep.mubr.msk.f32.mxu0 %vm2303_vm6, %v2368_v5 }
0x2bf1   :  { %3102 = vmatmul.mubr.msk.f32.gmra.mrb[38].mxu0 %vm2303_vm6, %v2369_v7 }
0x2cb8   :  { %v3094_v62 = vpop.f32.mrb[32].mxu0 }
0x2cb9   :  { %v2528_v27 = vmul.f32 %v3094_v62, %v2506_v0  ;;  %v2464_v18 = vpop.f32.mrb[33].mxu0 }
0x2cba   :  { %v2527_v49 = vmul.f32 %v2504_v17, %v2464_v18 }
0x2cbb   :  { %v2536_v8 = vsel %vm194_vm5, %v2528_v27, 0.0 }
0x2cbc   :  { %v2535_v19 = vsel %vm194_vm5, %v2527_v49, 0.0  ;;  %v3097_v14 = vpop.f32.mrb[34].mxu0 }
0x2cbd   :  { %v2537_v20 = vadd.f32 %v2536_v8, %v2535_v19  ;;  %v2474_v22 = vpop.f32.mrb[35].mxu0  ;;  %v2530_v47 = vmul.f32 %v3097_v14, %v2510_v30 }
0x2cbe   :  { %v2529_v24 = vmul.f32 %v2508_v15, %v2474_v22 }
0x2cbf   :  { %v2540_v32 = vsel %vm194_vm5, %v2530_v47, 0.0 }
0x2cc0   :  { %v2538_v28 = vsel %vm194_vm5, %v2529_v24, 0.0  ;;  %v3100_v29 = vpop.f32.mrb[36].mxu0 }
0x2cc1   :  { %v2539_v31 = vadd.f32 %v2538_v28, %v2537_v20  ;;  %v2484_v26 = vpop.f32.mrb[37].mxu0  ;;  %v2532_v33 = vmul.f32 %v3100_v29, %v2514_v23 }
0x2cc2   :  { %v2531_v34 = vmul.f32 %v2512_v25, %v2484_v26 }
0x2cc3   :  { %v2541_v35 = vadd.f32 %v2540_v32, %v2539_v31  ;;  %v2544_v42 = vsel %vm194_vm5, %v2532_v33, 0.0 }
0x2cc4   :  { %v2542_v37 = vsel %vm194_vm5, %v2531_v34, 0.0  ;;  %v3103_v38 = vpop.f32.mrb[38].mxu0 }
0x2cc5   :  { %v2543_v40 = vadd.f32 %v2542_v37, %v2541_v35  ;;  %v2494_v41 = vpop.f32.mrb[39].mxu0  ;;  %v2534_v45 = vmul.f32 %v3103_v38, %v2518_v36 }
0x2cc6   :  { %v2533_v44 = vmul.f32 %v2516_v39, %v2494_v41 }
0x2cc7   :  { %v2545_v46 = vadd.f32 %v2544_v42, %v2543_v40  ;;  %v2548_v21 = vsel %vm194_vm5, %v2534_v45, 0.0 }
0x2cc8   :  { %v2546_v48 = vsel %vm194_vm5, %v2533_v44, 0.0 }
0x2cc9   :  { %v2547_v50 = vadd.f32 %v2546_v48, %v2545_v46 }
0x2ccb   :  { %v2549_v52 = vadd.f32 %v2548_v21, %v2547_v50 }
0x2ccd   :  { %3113 = vmatmul.mubr.msk.f32.vlgmr.msra.gmra.mrb[32].mxu1 %vm194_vm5, %v2549_v52 }
0x2da0   :  { %v2628_v54 = vpop.f32.mrb[32].mxu1 }
0x2da1   :  { %v2629_v1 = vadd.f32 %v2699_v53, %v2628_v54  ;;  %v3114_v55 = vpop.f32.mrb[33].mxu1 }
0x2da3   :  { %2633 = vst.msk [vmem:[%s3897_s5] sm:$0xff] %vm2632_vm10, %v2629_v1 }

</bundles_post_ra>
